<compile_context>
chip_gen: v7x
topology: tpu7x:2x2x1
jax: 0.10.0
libtpu: 0.0.40
codegen_flags: <defaults>
</compile_context>

<pallas_src>
import functools

import jax
import jax.numpy as jnp
import numpy as np
from jax.experimental import pallas as pl
from jax.experimental.pallas import tpu as pltpu

TOKEN_SELF_ATTN_VALUE = -50000.0


# ----------------------------------------------------------------------------
# Pallas kernel: one (batch, block-of-Cb-chunks) step of LSH bucket attention
# ----------------------------------------------------------------------------
def _lsh_chunk_attn_kernel(bq_ref, bqe_ref, bv_ref, bve_ref, qt_ref, ktc_ref,
                           o_ref, lse_ref, *, scale):
    cb = bq_ref.shape[1]
    f32 = jnp.float32

    bq = bq_ref[0]          # (cb, m, d)   compute dtype (bf16 or f32)
    bq_e = bqe_ref[0]       # (1,  m, d)   chunk preceding this block (wrap-around)
    bv = bv_ref[0]          # (cb, m, d)
    bv_e = bve_ref[0]       # (1,  m, d)
    qt = qt_ref[0]          # (cb, m, 1)   int32 query token positions
    ktc = ktc_ref[0]        # (cb, 1, 2m)  int32 key positions [current, previous]

    mm_dtype = bq.dtype

    # Shared-QK Reformer: K is the L2-normalized Q.  Normalizing in-kernel (f32)
    # saves a full (B, C, m, d) HBM stream on this memory-bound kernel.
    def _l2_normalize(x):
        n = jnp.sqrt(jnp.sum(x * x, axis=-1, keepdims=True))
        return x / jnp.maximum(n, 1e-12)

    bq_f = bq.astype(f32)
    bk = _l2_normalize(bq_f).astype(mm_dtype)                    # (cb, m, d)
    bk_e = _l2_normalize(bq_e.astype(f32)).astype(mm_dtype)      # (1,  m, d)
    # Fold the softmax scale into Q (d-wide tile) instead of the 2m-wide scores.
    bq_s = (bq_f * scale).astype(mm_dtype)                       # (cb, m, d)

    # Look-one-back rebuilt in VMEM: previous chunk of chunk j is chunk j-1 of
    # the same block, except chunk 0 which uses the edge chunk.
    if cb > 1:
        bk_prev = jnp.concatenate([bk_e, bk[:-1]], axis=0)       # (cb, m, d)
        bv_prev = jnp.concatenate([bv_e, bv[:-1]], axis=0)       # (cb, m, d)
    else:
        bk_prev, bv_prev = bk_e, bv_e

    # Fused [current, previous] key/value tiles -> one 2m-wide matmul each.
    # TODO(synk): if vld/vst slots ever saturate (v7x), replace these copies with
    # a (cb+1, m, d) staging view and overlapping windows.
    bk_cat = jnp.concatenate([bk, bk_prev], axis=1)              # (cb, 2m, d)
    bv_cat = jnp.concatenate([bv, bv_prev], axis=1)              # (cb, 2m, d)

    dots = jnp.einsum('cie,cje->cij', bq_s, bk_cat,
                      preferred_element_type=f32)                # (cb, m, 2m) f32

    # Self-attention mask: a query must not attend to its own token position.
    dots = jnp.where(qt == ktc, TOKEN_SELF_ATTN_VALUE, dots)

    # Numerically stable softmax over the 2m keys (f32), single exp pass.
    mx = jnp.max(dots, axis=-1, keepdims=True)                   # (cb, m, 1)
    e = jnp.exp(dots - mx)
    s = jnp.sum(e, axis=-1, keepdims=True)                       # (cb, m, 1)
    lse = mx + jnp.log(s)
    # Exact reciprocal (tiny tile) keeps o / lse mutually consistent for the
    # downstream cross-hash-round recombination.
    p = (e * pl.reciprocal(s)).astype(bv_cat.dtype)

    bo = jnp.einsum('cij,cje->cie', p, bv_cat,
                    preferred_element_type=f32)                  # (cb, m, d) f32

    o_ref[0] = bo.astype(o_ref.dtype)
    lse_ref[0, 0] = lse[:, :, 0].astype(lse_ref.dtype)


# ----------------------------------------------------------------------------
# Tiling / VMEM helpers
# ----------------------------------------------------------------------------
def _vmem_capacity_bytes(default=64 * 1024 * 1024):
    """Per-core VMEM capacity; conservative 64 MiB fallback (fits every gen)."""
    try:
        cap = int(getattr(pltpu.get_tpu_info(), "vmem_capacity_bytes", 0))
        if cap > 0:
            return min(cap, 128 * 1024 * 1024)
    except Exception:
        pass
    return default


def _choose_chunk_block(C, m, d, in_itemsize, out_itemsize, vmem_capacity,
                        max_cb=256):
    """Pick how many buckets to process per grid step, within a VMEM budget.

    The flat sum below over-counts (sequential temporaries are reused by the
    compiler), so the budget is a conservative fraction of physical VMEM.
    """
    lane = 128
    d_p = -(-d // lane) * lane                     # lane-padded head dim
    k_p = max(-(-2 * m // lane) * lane, lane)      # lane-padded 2m score width
    per_chunk = (
        2 * 2 * m * d_p * in_itemsize     # double-buffered Q / V input blocks
        + 2 * m * lane * 4                # double-buffered qt block (lane-padded)
        + 2 * 8 * k_p * 4                 # double-buffered key-position block
        + 2 * m * d_p * out_itemsize      # double-buffered output block
        + 2 * lane * 4                    # double-buffered lse block
        + 3 * m * d_p * 4                 # f32 copies of Q (normalized / scaled)
        + 2 * 2 * m * d_p * in_itemsize   # fused [cur, prev] K / V tiles
        + 3 * m * k_p * 4                 # dots / exp tiles (f32)
        + 1 * m * k_p * in_itemsize       # probabilities cast to matmul dtype
        + 1 * m * d_p * 4                 # f32 PV accumulator
    )
    budget = min(int(0.35 * vmem_capacity), 44 * 1024 * 1024)
    cb = int(max(1, min(C, max_cb, budget // max(per_chunk, 1))))
    while C % cb:
        cb -= 1
    return cb


def chunked_lsh_attention(bq, bv, bt, *, chunk_block=None,
                          compute_dtype=jnp.bfloat16, out_dtype=None):
    """bq/bv: (B, C, m, d); bt: (B, C, m) int token positions.

    Returns bo (B, C, m, d) in out_dtype and logsumexp (B, C, m) f32.
    K is derived in-kernel as the L2 normalization of Q (shared-QK attention).
    """
    B, C, m, d = bq.shape
    out_dtype = compute_dtype if out_dtype is None else out_dtype
    cap = _vmem_capacity_bytes()
    in_itemsize = jnp.dtype(compute_dtype).itemsize
    out_itemsize = jnp.dtype(out_dtype).itemsize
    cb = chunk_block if chunk_block is not None else _choose_chunk_block(
        C, m, d, in_itemsize, out_itemsize, cap)
    assert C % cb == 0
    nb = C // cb
    scale = float(d) ** -0.5

    bq_c = bq.astype(compute_dtype)
    bv_c = bv.astype(compute_dtype)
    bt_i = bt.astype(jnp.int32)

    # Token positions for the self-attention mask (tiny vs. the K/V traffic).
    qt = bt_i[:, :, :, None]                                          # (B, C, m, 1)
    kt = bt_i[:, :, None, :]                                          # (B, C, 1, m)
    ktc = jnp.concatenate([kt, jnp.roll(kt, 1, axis=1)], axis=-1)     # (B, C, 1, 2m)

    # Megacore: lead with an even-extent parallel axis so neither core idles.
    lead_chunks = (B % 2 == 1) and (nb % 2 == 0) and nb > 1
    grid = (nb, B) if lead_chunks else (B, nb)

    def _bc(g0, g1):
        return (g1, g0) if lead_chunks else (g0, g1)

    def main_idx(g0, g1):
        b, c = _bc(g0, g1)
        return (b, c, 0, 0)

    def edge_idx(g0, g1):
        # Chunk preceding the block's first chunk, with wrap-around (matches
        # look_one_back's roll over the chunk axis).  Fetched via index_map
        # straight from the original arrays -- no wrapper-side gather.
        b, c = _bc(g0, g1)
        return (b, (c * cb + C - 1) % C, 0, 0)

    kernel = functools.partial(_lsh_chunk_attn_kernel, scale=scale)
    out_shape = (
        jax.ShapeDtypeStruct((B, C, m, d), out_dtype),
        jax.ShapeDtypeStruct((B, nb, cb, m), jnp.float32),     # lane-dense lse
    )

    bo, lse4 = pl.pallas_call(
        kernel,
        out_shape=out_shape,
        grid=grid,
        in_specs=[
            pl.BlockSpec((1, cb, m, d), main_idx),      # Q (also the K source)
            pl.BlockSpec((1, 1, m, d), edge_idx),       # Q edge chunk
            pl.BlockSpec((1, cb, m, d), main_idx),      # V
            pl.BlockSpec((1, 1, m, d), edge_idx),       # V edge chunk
            pl.BlockSpec((1, cb, m, 1), main_idx),      # query positions
            pl.BlockSpec((1, cb, 1, 2 * m), main_idx),  # key positions [cur, prev]
        ],
        out_specs=[
            pl.BlockSpec((1, cb, m, d), main_idx),
            pl.BlockSpec((1, 1, cb, m), main_idx),
        ],
        compiler_params=pltpu.CompilerParams(
            dimension_semantics=("parallel", "parallel"),
            vmem_limit_bytes=int(min(0.85 * cap, 100 * 1024 * 1024)),
        ),
    )(bq_c, bq_c, bv_c, bv_c, qt, ktc)

    return bo, lse4.reshape(B, C, m)


# ----------------------------------------------------------------------------
# JAX glue: hashing, sorting, gathers, unsort, cross-round combination
# ----------------------------------------------------------------------------
def hash_vectors(rot_key, qk, n_buckets, n_hashes):
    B, T, F = qk.shape
    assert n_buckets % 2 == 0
    rot = jax.random.normal(rot_key, (1, F, n_hashes, n_buckets // 2),
                            dtype=qk.dtype)
    rot = jnp.broadcast_to(rot, (B, F, n_hashes, n_buckets // 2))
    rotated = jnp.einsum('btf,bfhi->bhti', qk, rot)          # (B, H, T, nb/2)
    rotated = jnp.concatenate([rotated, -rotated], axis=-1)  # (B, H, T, nb)
    buckets = jnp.argmax(rotated, axis=-1)                   # (B, H, T)
    offsets = (jnp.arange(n_hashes) * n_buckets).reshape(1, -1, 1)
    return (buckets + offsets).reshape(B, -1)                # (B, H*T)


def lsh_attention_forward(qk, v, rot_key, *, bucket_size, n_hashes,
                          use_pallas=True, compute_dtype=jnp.bfloat16,
                          out_dtype=None, chunk_block=None):
    B, T, D = qk.shape
    assert T % (bucket_size * 2) == 0
    n_buckets = T // bucket_size
    total_hashes = n_hashes

    buckets = hash_vectors(rot_key, qk, n_buckets, n_hashes)      # (B, H*T)

    ticker = jnp.broadcast_to(jnp.arange(total_hashes * T)[None, :],
                              (B, total_hashes * T))
    buckets_and_t = T * buckets + (ticker % T)

    sticker = jnp.argsort(buckets_and_t, axis=-1).astype(jnp.int32)
    undo_sort = jnp.argsort(sticker, axis=-1).astype(jnp.int32)

    st = sticker % T
    sqk = jnp.take_along_axis(qk, st[:, :, None], axis=1)
    sv = jnp.take_along_axis(v, st[:, :, None], axis=1)

    C = total_hashes * n_buckets                                  # chunks
    m = bucket_size
    bt = st.reshape(B, C, m)                                      # token positions
    bq = sqk.reshape(B, C, m, D)
    bv_ = sv.reshape(B, C, m, D)

    if use_pallas:
        bo, lse = chunked_lsh_attention(bq, bv_, bt,
                                        chunk_block=chunk_block,
                                        compute_dtype=compute_dtype,
                                        out_dtype=out_dtype)
    else:
        # pure-JAX f32 reference of the hot path (materialized look-one-back)
        norm = jnp.sqrt(jnp.sum(bq * bq, axis=-1, keepdims=True))
        bk = bq / jnp.maximum(norm, 1e-12)                        # F.normalize

        def look_one_back(x):
            x_extra = jnp.concatenate([x[:, -1:], x[:, :-1]], axis=1)
            return jnp.concatenate([x, x_extra], axis=2)

        bk2 = look_one_back(bk)
        bv2 = look_one_back(bv_)
        bkt = look_one_back(bt)
        dots = jnp.einsum('bcie,bcje->bcij', bq, bk2) * (D ** -0.5)
        dots = jnp.where(bt[:, :, :, None] == bkt[:, :, None, :],
                         TOKEN_SELF_ATTN_VALUE, dots)
        lse4 = jax.scipy.special.logsumexp(dots, axis=-1, keepdims=True)
        p = jnp.exp(dots - lse4)
        bo = jnp.einsum('bcij,bcje->bcie', p, bv2)
        lse = lse4[..., 0]

    so = bo.reshape(B, -1, D)
    slogits = lse.reshape(B, -1)

    o = jnp.take_along_axis(so, undo_sort[:, :, None], axis=1)
    logits = jnp.take_along_axis(slogits, undo_sort, axis=1)

    o = o.reshape(B, total_hashes, T, D)
    logits = logits.reshape(B, total_hashes, T, 1)

    probs = jnp.exp(logits - jax.scipy.special.logsumexp(logits, axis=1,
                                                         keepdims=True))
    out = jnp.sum(o * probs, axis=1)                              # (B, T, D)

    # TODO(synk): self._return_attn scatter_add path not implemented (default False).
    attn = jnp.zeros((0,), dtype=qk.dtype)
    return out, attn, buckets


# ----------------------------------------------------------------------------
if __name__ == "__main__":
    key = jax.random.PRNGKey(0)
    k_qk, k_v, k_rot = jax.random.split(key, 3)

    B, T, D = 2, 64, 32
    bucket_size, n_hashes = 16, 2        # seqlen % (bucket_size*2) == 0

    qk = jax.random.normal(k_qk, (B, T, D), dtype=jnp.float32)
    v = jax.random.normal(k_v, (B, T, D), dtype=jnp.float32)

    # pure-JAX f32 reference of the whole forward
    out_ref, _, _ = lsh_attention_forward(
        qk, v, k_rot, bucket_size=bucket_size, n_hashes=n_hashes,
        use_pallas=False)
    out_ref = jax.block_until_ready(out_ref)

    # Pallas kernel with f32 matmul operands + f32 output: tight parity check
    out_f32, _, _ = lsh_attention_forward(
        qk, v, k_rot, bucket_size=bucket_size, n_hashes=n_hashes,
        use_pallas=True, compute_dtype=jnp.float32)
    out_f32 = jax.block_until_ready(out_f32)
    np.testing.assert_allclose(np.asarray(out_f32), np.asarray(out_ref),
                               rtol=5e-3, atol=5e-3)

    # Pallas kernel with bf16 matmul operands + bf16 output (production config)
    out_bf16, attn, buckets = lsh_attention_forward(
        qk, v, k_rot, bucket_size=bucket_size, n_hashes=n_hashes,
        use_pallas=True, compute_dtype=jnp.bfloat16)
    out_bf16 = jax.block_until_ready(out_bf16)
    np.testing.assert_allclose(np.asarray(out_bf16), np.asarray(out_ref),
                               rtol=8e-2, atol=8e-2)

    print("KERNEL_OK")
</pallas_src>

<mosaic_0001>
module attributes {stable_mosaic.version = 11 : i64} {
  func.func @_lsh_chunk_attn_kernel(%arg0: i32, %arg1: i32, %arg2: memref<1x8x16x32xf32, #tpu.memory_space<vmem>>, %arg3: memref<1x1x16x32xf32, #tpu.memory_space<vmem>>, %arg4: memref<1x8x16x32xf32, #tpu.memory_space<vmem>>, %arg5: memref<1x1x16x32xf32, #tpu.memory_space<vmem>>, %arg6: memref<1x8x16x1xi32, #tpu.memory_space<vmem>>, %arg7: memref<1x8x1x32xi32, #tpu.memory_space<vmem>>, %arg8: memref<1x8x16x32xf32, #tpu.memory_space<vmem>>, %arg9: memref<1x1x8x16xf32, #tpu.memory_space<vmem>>) attributes {dimension_semantics = [#tpu.dimension_semantics<parallel>, #tpu.dimension_semantics<parallel>], iteration_bounds = array<i64: 2, 1>, scalar_prefetch = 0 : i64, scratch_operands = 0 : i64, tpu.core_type = #tpu.core_type<tc>, window_params = [{transform_indices = @transform_0, window_bounds = array<i64: 1, 8, 16, 32>}, {transform_indices = @transform_1, window_bounds = array<i64: 1, 1, 16, 32>}, {transform_indices = @transform_2, window_bounds = array<i64: 1, 8, 16, 32>}, {transform_indices = @transform_3, window_bounds = array<i64: 1, 1, 16, 32>}, {transform_indices = @transform_4, window_bounds = array<i64: 1, 8, 16, 1>}, {transform_indices = @transform_5, window_bounds = array<i64: 1, 8, 1, 32>}, {transform_indices = @transform_6, window_bounds = array<i64: 1, 8, 16, 32>}, {transform_indices = @transform_7, window_bounds = array<i64: 1, 1, 8, 16>}]} {
    %c0 = arith.constant 0 : index
    %c0_0 = arith.constant 0 : index
    %c0_1 = arith.constant 0 : index
    %c0_2 = arith.constant 0 : index
    %0 = vector.load %arg2[%c0, %c0_0, %c0_1, %c0_2] : memref<1x8x16x32xf32, #tpu.memory_space<vmem>>, vector<1x8x16x32xf32>
    %1 = vector.shape_cast %0 : vector<1x8x16x32xf32> to vector<8x16x32xf32>
    %c0_3 = arith.constant 0 : index
    %c0_4 = arith.constant 0 : index
    %c0_5 = arith.constant 0 : index
    %c0_6 = arith.constant 0 : index
    %2 = vector.load %arg3[%c0_3, %c0_4, %c0_5, %c0_6] : memref<1x1x16x32xf32, #tpu.memory_space<vmem>>, vector<1x1x16x32xf32>
    %3 = vector.shape_cast %2 : vector<1x1x16x32xf32> to vector<1x16x32xf32>
    %c0_7 = arith.constant 0 : index
    %c0_8 = arith.constant 0 : index
    %c0_9 = arith.constant 0 : index
    %c0_10 = arith.constant 0 : index
    %4 = vector.load %arg4[%c0_7, %c0_8, %c0_9, %c0_10] : memref<1x8x16x32xf32, #tpu.memory_space<vmem>>, vector<1x8x16x32xf32>
    %5 = vector.shape_cast %4 : vector<1x8x16x32xf32> to vector<8x16x32xf32>
    %c0_11 = arith.constant 0 : index
    %c0_12 = arith.constant 0 : index
    %c0_13 = arith.constant 0 : index
    %c0_14 = arith.constant 0 : index
    %6 = vector.load %arg5[%c0_11, %c0_12, %c0_13, %c0_14] : memref<1x1x16x32xf32, #tpu.memory_space<vmem>>, vector<1x1x16x32xf32>
    %7 = vector.shape_cast %6 : vector<1x1x16x32xf32> to vector<1x16x32xf32>
    %c0_15 = arith.constant 0 : index
    %c0_16 = arith.constant 0 : index
    %c0_17 = arith.constant 0 : index
    %c0_18 = arith.constant 0 : index
    %8 = vector.load %arg6[%c0_15, %c0_16, %c0_17, %c0_18] : memref<1x8x16x1xi32, #tpu.memory_space<vmem>>, vector<1x8x16x1xi32>
    %9 = vector.shape_cast %8 : vector<1x8x16x1xi32> to vector<8x16x1xi32>
    %c0_19 = arith.constant 0 : index
    %c0_20 = arith.constant 0 : index
    %c0_21 = arith.constant 0 : index
    %c0_22 = arith.constant 0 : index
    %10 = vector.load %arg7[%c0_19, %c0_20, %c0_21, %c0_22] : memref<1x8x1x32xi32, #tpu.memory_space<vmem>>, vector<1x8x1x32xi32>
    %11 = vector.shape_cast %10 : vector<1x8x1x32xi32> to vector<8x1x32xi32>
    %12 = arith.mulf %1, %1 : vector<8x16x32xf32>
    %cst = arith.constant dense<0.000000e+00> : vector<8x16xf32>
    %13 = vector.multi_reduction <add>, %12, %cst [2] : vector<8x16x32xf32> to vector<8x16xf32>
    %14 = vector.shape_cast %13 : vector<8x16xf32> to vector<8x16x1xf32>
    %15 = math.sqrt %14 : vector<8x16x1xf32>
    %cst_23 = arith.constant 9.99999996E-13 : f32
    %16 = vector.broadcast %cst_23 : f32 to vector<8x16x1xf32>
    %17 = arith.maximumf %15, %16 : vector<8x16x1xf32>
    %18 = vector.broadcast %17 : vector<8x16x1xf32> to vector<8x16x32xf32>
    %19 = arith.divf %1, %18 : vector<8x16x32xf32>
    %20 = arith.mulf %3, %3 : vector<1x16x32xf32>
    %cst_24 = arith.constant dense<0.000000e+00> : vector<1x16xf32>
    %21 = vector.multi_reduction <add>, %20, %cst_24 [2] : vector<1x16x32xf32> to vector<1x16xf32>
    %22 = vector.shape_cast %21 : vector<1x16xf32> to vector<1x16x1xf32>
    %23 = math.sqrt %22 : vector<1x16x1xf32>
    %cst_25 = arith.constant 9.99999996E-13 : f32
    %24 = vector.broadcast %cst_25 : f32 to vector<1x16x1xf32>
    %25 = arith.maximumf %23, %24 : vector<1x16x1xf32>
    %26 = vector.broadcast %25 : vector<1x16x1xf32> to vector<1x16x32xf32>
    %27 = arith.divf %3, %26 : vector<1x16x32xf32>
    %cst_26 = arith.constant 0.176776692 : f32
    %28 = vector.broadcast %cst_26 : f32 to vector<8x16x32xf32>
    %29 = arith.mulf %1, %28 : vector<8x16x32xf32>
    %30 = vector.extract_strided_slice %19 {offsets = [0, 0, 0], sizes = [7, 16, 32], strides = [1, 1, 1]} : vector<8x16x32xf32> to vector<7x16x32xf32>
    %31 = tpu.concatenate %27, %30 in 0 : vector<1x16x32xf32>, vector<7x16x32xf32> -> vector<8x16x32xf32>
    %32 = vector.extract_strided_slice %5 {offsets = [0, 0, 0], sizes = [7, 16, 32], strides = [1, 1, 1]} : vector<8x16x32xf32> to vector<7x16x32xf32>
    %33 = tpu.concatenate %7, %32 in 0 : vector<1x16x32xf32>, vector<7x16x32xf32> -> vector<8x16x32xf32>
    %34 = tpu.concatenate %19, %31 in 1 : vector<8x16x32xf32>, vector<8x16x32xf32> -> vector<8x32x32xf32>
    %35 = tpu.concatenate %5, %33 in 1 : vector<8x16x32xf32>, vector<8x16x32xf32> -> vector<8x32x32xf32>
    "tpu.trace_start"() <{level = 10 : i32, message = "cie,cje->cij"}> : () -> ()
    %cst_27 = arith.constant dense<0.000000e+00> : vector<8x16x32xf32>
    %36 = tpu.matmul %29, %34, %cst_27 {dimension_numbers = #tpu.dot_dimension_numbers<[2], [2], [1], [1], [0, 0, 0, 1, 1, 1], [0], [0]>} : vector<8x16x32xf32>, vector<8x32x32xf32>, vector<8x16x32xf32> -> vector<8x16x32xf32>
    "tpu.trace_stop"() : () -> ()
    %37 = vector.broadcast %9 : vector<8x16x1xi32> to vector<8x16x32xi32>
    %38 = vector.broadcast %11 : vector<8x1x32xi32> to vector<8x16x32xi32>
    %39 = arith.cmpi eq, %37, %38 : vector<8x16x32xi32>
    %cst_28 = arith.constant -5.000000e+04 : f32
    %40 = vector.broadcast %cst_28 : f32 to vector<8x16x32xf32>
    %41 = arith.select %39, %40, %36 : vector<8x16x32xi1>, vector<8x16x32xf32>
    %cst_29 = arith.constant dense<0xFF800000> : vector<8x16xf32>
    %42 = vector.multi_reduction <maximumf>, %41, %cst_29 [2] : vector<8x16x32xf32> to vector<8x16xf32>
    %43 = vector.shape_cast %42 : vector<8x16xf32> to vector<8x16x1xf32>
    %44 = vector.broadcast %43 : vector<8x16x1xf32> to vector<8x16x32xf32>
    %45 = arith.subf %41, %44 : vector<8x16x32xf32>
    %46 = math.exp %45 : vector<8x16x32xf32>
    %cst_30 = arith.constant dense<0.000000e+00> : vector<8x16xf32>
    %47 = vector.multi_reduction <add>, %46, %cst_30 [2] : vector<8x16x32xf32> to vector<8x16xf32>
    %48 = vector.shape_cast %47 : vector<8x16xf32> to vector<8x16x1xf32>
    %49 = math.log %48 : vector<8x16x1xf32>
    %50 = arith.addf %43, %49 : vector<8x16x1xf32>
    %51 = tpu.reciprocal %48 : vector<8x16x1xf32> -> vector<8x16x1xf32>
    %52 = vector.broadcast %51 : vector<8x16x1xf32> to vector<8x16x32xf32>
    %53 = arith.mulf %46, %52 : vector<8x16x32xf32>
    "tpu.trace_start"() <{level = 10 : i32, message = "cij,cje->cie"}> : () -> ()
    %cst_31 = arith.constant dense<0.000000e+00> : vector<8x16x32xf32>
    %54 = tpu.matmul %53, %35, %cst_31 {dimension_numbers = #tpu.dot_dimension_numbers<[2], [1], [1], [2], [0, 0, 0, 1, 1, 2], [0], [0]>} : vector<8x16x32xf32>, vector<8x32x32xf32>, vector<8x16x32xf32> -> vector<8x16x32xf32>
    "tpu.trace_stop"() : () -> ()
    %c0_32 = arith.constant 0 : index
    %c0_33 = arith.constant 0 : index
    %c0_34 = arith.constant 0 : index
    %c0_35 = arith.constant 0 : index
    %55 = vector.load %arg8[%c0_32, %c0_33, %c0_34, %c0_35] : memref<1x8x16x32xf32, #tpu.memory_space<vmem>>, vector<1x8x16x32xf32>
    %56 = vector.shape_cast %55 : vector<1x8x16x32xf32> to vector<8x16x32xf32>
    %57 = vector.shape_cast %54 : vector<8x16x32xf32> to vector<1x8x16x32xf32>
    tpu.vector_store %arg8[%c0_32, %c0_33, %c0_34, %c0_35], %57 {strides = array<i32>} : memref<1x8x16x32xf32, #tpu.memory_space<vmem>>, vector<1x8x16x32xf32>,
    %58 = vector.shape_cast %50 : vector<8x16x1xf32> to vector<8x16xf32>
    %c0_36 = arith.constant 0 : index
    %c0_37 = arith.constant 0 : index
    %c0_38 = arith.constant 0 : index
    %c0_39 = arith.constant 0 : index
    %59 = vector.load %arg9[%c0_36, %c0_37, %c0_38, %c0_39] : memref<1x1x8x16xf32, #tpu.memory_space<vmem>>, vector<1x1x8x16xf32>
    %60 = vector.shape_cast %59 : vector<1x1x8x16xf32> to vector<8x16xf32>
    %61 = vector.shape_cast %58 : vector<8x16xf32> to vector<1x1x8x16xf32>
    tpu.vector_store %arg9[%c0_36, %c0_37, %c0_38, %c0_39], %61 {strides = array<i32>} : memref<1x1x8x16xf32, #tpu.memory_space<vmem>>, vector<1x1x8x16xf32>,
    return
  }
  func.func @transform_0(%arg0: i32, %arg1: i32) -> (i32, i32, i32, i32) {
    %c0_i32 = arith.constant 0 : i32
    %c0_i32_0 = arith.constant 0 : i32
    %c0_i32_1 = arith.constant 0 : i32
    return %arg0, %arg1, %c0_i32, %c0_i32_0 : i32, i32, i32, i32
  }
  func.func @transform_1(%arg0: i32, %arg1: i32) -> (i32, i32, i32, i32) {
    %c8_i32 = arith.constant 8 : i32
    %0 = arith.muli %arg1, %c8_i32 : i32
    %c8_i32_0 = arith.constant 8 : i32
    %1 = arith.addi %0, %c8_i32_0 : i32
    %c1_i32 = arith.constant 1 : i32
    %2 = arith.subi %1, %c1_i32 : i32
    %c8_i32_1 = arith.constant 8 : i32
    %c0_i32 = arith.constant 0 : i32
    %3 = arith.cmpi eq, %c8_i32_1, %c0_i32 : i32
    %c1_i32_2 = arith.constant 1 : i32
    %4 = arith.select %3, %c1_i32_2, %c8_i32_1 : i32
    %5 = arith.remsi %2, %4 : i32
    %c0_i32_3 = arith.constant 0 : i32
    %6 = arith.cmpi ne, %5, %c0_i32_3 : i32
    %c0_i32_4 = arith.constant 0 : i32
    %7 = arith.cmpi slt, %5, %c0_i32_4 : i32
    %c0_i32_5 = arith.constant 0 : i32
    %8 = arith.cmpi slt, %4, %c0_i32_5 : i32
    %9 = arith.xori %7, %8 : i1
    %10 = arith.andi %9, %6 : i1
    %11 = arith.addi %5, %4 : i32
    %12 = arith.select %10, %11, %5 : i32
    %c0_i32_6 = arith.constant 0 : i32
    %c0_i32_7 = arith.constant 0 : i32
    %c0_i32_8 = arith.constant 0 : i32
    return %arg0, %12, %c0_i32_6, %c0_i32_7 : i32, i32, i32, i32
  }
  func.func @transform_2(%arg0: i32, %arg1: i32) -> (i32, i32, i32, i32) {
    %c0_i32 = arith.constant 0 : i32
    %c0_i32_0 = arith.constant 0 : i32
    %c0_i32_1 = arith.constant 0 : i32
    return %arg0, %arg1, %c0_i32, %c0_i32_0 : i32, i32, i32, i32
  }
  func.func @transform_3(%arg0: i32, %arg1: i32) -> (i32, i32, i32, i32) {
    %c8_i32 = arith.constant 8 : i32
    %0 = arith.muli %arg1, %c8_i32 : i32
    %c8_i32_0 = arith.constant 8 : i32
    %1 = arith.addi %0, %c8_i32_0 : i32
    %c1_i32 = arith.constant 1 : i32
    %2 = arith.subi %1, %c1_i32 : i32
    %c8_i32_1 = arith.constant 8 : i32
    %c0_i32 = arith.constant 0 : i32
    %3 = arith.cmpi eq, %c8_i32_1, %c0_i32 : i32
    %c1_i32_2 = arith.constant 1 : i32
    %4 = arith.select %3, %c1_i32_2, %c8_i32_1 : i32
    %5 = arith.remsi %2, %4 : i32
    %c0_i32_3 = arith.constant 0 : i32
    %6 = arith.cmpi ne, %5, %c0_i32_3 : i32
    %c0_i32_4 = arith.constant 0 : i32
    %7 = arith.cmpi slt, %5, %c0_i32_4 : i32
    %c0_i32_5 = arith.constant 0 : i32
    %8 = arith.cmpi slt, %4, %c0_i32_5 : i32
    %9 = arith.xori %7, %8 : i1
    %10 = arith.andi %9, %6 : i1
    %11 = arith.addi %5, %4 : i32
    %12 = arith.select %10, %11, %5 : i32
    %c0_i32_6 = arith.constant 0 : i32
    %c0_i32_7 = arith.constant 0 : i32
    %c0_i32_8 = arith.constant 0 : i32
    return %arg0, %12, %c0_i32_6, %c0_i32_7 : i32, i32, i32, i32
  }
  func.func @transform_4(%arg0: i32, %arg1: i32) -> (i32, i32, i32, i32) {
    %c0_i32 = arith.constant 0 : i32
    %c0_i32_0 = arith.constant 0 : i32
    %c0_i32_1 = arith.constant 0 : i32
    return %arg0, %arg1, %c0_i32, %c0_i32_0 : i32, i32, i32, i32
  }
  func.func @transform_5(%arg0: i32, %arg1: i32) -> (i32, i32, i32, i32) {
    %c0_i32 = arith.constant 0 : i32
    %c0_i32_0 = arith.constant 0 : i32
    %c0_i32_1 = arith.constant 0 : i32
    return %arg0, %arg1, %c0_i32, %c0_i32_0 : i32, i32, i32, i32
  }
  func.func @transform_6(%arg0: i32, %arg1: i32) -> (i32, i32, i32, i32) {
    %c0_i32 = arith.constant 0 : i32
    %c0_i32_0 = arith.constant 0 : i32
    %c0_i32_1 = arith.constant 0 : i32
    return %arg0, %arg1, %c0_i32, %c0_i32_0 : i32, i32, i32, i32
  }
  func.func @transform_7(%arg0: i32, %arg1: i32) -> (i32, i32, i32, i32) {
    %c0_i32 = arith.constant 0 : i32
    %c0_i32_0 = arith.constant 0 : i32
    %c0_i32_1 = arith.constant 0 : i32
    return %arg0, %arg1, %c0_i32, %c0_i32_0 : i32, i32, i32, i32
  }
}

</mosaic_0001>

<bundles_post_ra>
// kernel: tpu_custom_call.1
= control target key start
LH: loop header
LB: loop body
LE: loop exit
PB: predicated region body
PF: predicated region fallthrough
CT: control target
= control target key end

     0   :  { %s5204_s0 = inlined_call_operand.vmem [shape: f32[2,8,16,32], index: 0, kind: input, shape index: {}]   ;;  %s5205_s1 = inlined_call_operand.hbm [shape: f32[2,8,16,32], index: 1, kind: input, shape index: {}]   ;;  %s5206_s2 = inlined_call_operand.hbm [shape: f32[2,8,16,32], index: 2, kind: input, shape index: {}]   ;;  %s5207_s3 = inlined_call_operand.hbm [shape: f32[2,8,16,32], index: 3, kind: input, shape index: {}]   ;;  %s5208_s4 = inlined_call_operand.vmem [shape: s32[2,8,16,1], index: 4, kind: input, shape index: {}]   ;;  %s5209_s5 = inlined_call_operand.vmem [shape: s32[2,8,1,32], index: 5, kind: input, shape index: {}]   ;;  %s5210_s6 = inlined_call_operand.hbm [shape: f32[2,8,16,32], index: 6, kind: output, shape index: {0}]   ;;  %s5211_s7 = inlined_call_operand.hbm [shape: f32[2,1,8,16], index: 7, kind: output, shape index: {1}]  }
   0x1   :  { %5227 = sst [smem:[#allocation22_spill]] %s5205_s1 }
   0x2   :  { %5228 = sst [smem:[#allocation23_spill]] %s5206_s2 }
   0x3   :  { %13 = vsyncpa [#allocation3], 0 }
   0x4   :  { %15 = vsyncpa [#allocation3 + $0x1], 0 }
   0x5   :  { %16 = vsyncpa [#allocation6], 0 }
   0x6   :  { %18 = vsyncpa [#allocation6 + $0x1], 0 }
   0x7   :  { %19 = vsyncpa [#allocation4], 0 }
   0x8   :  { %21 = vsyncpa [#allocation4 + $0x1], 0 }
   0x9   :  { %22 = vsyncpa [#allocation10], 0 }
   0xa   :  { %24 = vsyncpa [#allocation10 + $0x1], 0  ;;  %s4098_s24 = smov 0   ;;  %s4100_s25 = smov 0  }
   0xb   :  { %s4102_s26 = smov 0   ;;  %s4104_s27 = smov 0  }
   0xc   :  { %s4106_s28 = smov 0   ;;  %s4108_s29 = smov 0  }
   0xd LB: > { %5229 = sst [smem:[#allocation15_spill]] %s4026_s24  ;;  %s4129_s30 = sadd.s32 4294967295, %s4046_s29   ;;  %s4046_s29 = sphi %s4108_s29, %s30_s29   ;;  %s4042_s28 = sphi %s4106_s28, %s5264_s28   ;;  %s4038_s27 = sphi %s4104_s27, %s5263_s27   ;;  %s4034_s26 = sphi %s4102_s26, %s5262_s26   ;;  %s4030_s25 = sphi %s4100_s25, %s5266_s25   ;;  %s4026_s24 = sphi %s4098_s24, %s5265_s24  }
   0xe   : > { %5230 = sst [smem:[#allocation16_spill]] %s4034_s26  ;;  %s3042_s8 = sadd.s32 4294967294, %s4046_s29  }
   0xf   : > { %5231 = sst [smem:[#allocation17_spill]] %s4042_s28  ;;  %s42_s9 = sadd.s32 1, %s4042_s28 }
  0x10   : > { %5232 = sst [smem:[#allocation18_spill]] %s4046_s29  ;;  %s107_s10 = sadd.s32 1, %s4034_s26 }
  0x11   : > { %p44_p0 = scmp.ge.s32.totalorder %s42_s9, 2  ;;  %p114_p1 = scmp.ne.s32.totalorder %s4034_s26, %s4030_s25 }
  0x12   : > { %p115_p2 = scmp.eq.s32.totalorder %s4046_s29, 0  ;;  %p120_p3 = scmp.ne.s32.totalorder %s4030_s25, %s4026_s24 }
  0x13   : > { %s5268_s9 = smov (%p44_p0, %s42_s9), 0  ;;  %p121_p5 = scmp.eq.s32.totalorder %s4129_s30, 0 }
  0x14   : > { %5233 = sst [smem:[#allocation19_spill]] %s5268_s9  ;;  %p4141_p4 = por %p115_p2, %p114_p1 }
  0x15   : > { %s102_s12 = ssub.s32 %s4042_s28, %s5268_s9  ;;  %p286_p6 = scmp.eq.s32.totalorder %s4129_s30, 1 }
  0x16   : > { %p105_p7 = scmp.eq.s32.totalorder %s102_s12, 0  ;;  %p4149_p8 = por %p121_p5, %p120_p3 }
  0x17   : > { %p4153_p9 = por %p286_p6, %p114_p1  ;;  %p292_p10 = scmp.eq.s32.totalorder %s3042_s8, 1 }
  0x18   : > { %s5235_s13 = scalar_select %p4149_p8, 1, 0 }
  0x19   : > { %s5236_s14 = scalar_select %p4153_p9, 1, 0 }
  0x1a   : > { %s4158_s15 = scalar_select %p105_p7, %s4034_s26, %s107_s10  }
  0x1b   : > { %p4160_p11 = por %p292_p10, %p120_p3  ;;  %p3613_p13 = scmp.lt.s32.totalorder %s4046_s29, 2 }
  0x1c   : > { %5237 = sst [smem:[#allocation20_spill]] %s4158_s15  ;;  %s4167_s17 = sand.u32 1, %s4034_s26  }
  0x1d   : > { %s5238_s16 = scalar_select %p4160_p11, 1, 0 }
  0x1e   : > { %s5213_s18 = sshll.u32 %s4042_s28, 11  ;;  %p4172_p0 = pnand %p3613_p13, %p4141_p4 }
  0x1f   : > { %5239 = sst [smem:[#allocation21_spill]] %s5238_s16  ;;  %s391_s20 = sand.u32 1, %s4046_s29  }
  0x20   : > { %s3048_s21 = sshll.u32 %s4167_s17, 7  ;;  %s5241_s2 = sld [smem:[#allocation23_spill]] }
  0x21   : > { %s395_s10 = scalar_lea.vmem [#allocation5], %s3048_s21  ;;  %s4189_s11 = scalar_lea.sflag [#allocation6], %s391_s20 }
  0x22   : > { %s405_s12 = sshll.u32 %s395_s10, 4  ;;  %p4195_p4 = pneg %p4172_p0  ;;  %s4186_s12 = int_to_ptr.vmem [resolvable:$true] %s405_s12 }
  0x26   : > { %s4183_s8 = scalar_lea.hbm %s5241_s2, %s5213_s18  ;;  %s3843_s23 = scalar_lea.hbm %s5241_s2, 4096 }
  0x27   : > { %s3838_s9 = scalar_lea.hbm %s4183_s8, 2048  ;;  %p3844_p7 = scmp.lt.u32.totalorder %s4183_s8, %s5241_s2 }
  0x28   : > { %p3839_p3 = scmp.ne.s32.totalorder %s4183_s8, %s3838_s9  ;;  %p3845_p10 = scmp.lt.u32.totalorder %s3843_s23, %s3838_s9 }
  0x29   : > { %p3847_p12 = scmp.lt.u32.totalorder %s3838_s9, %s4183_s8 }
  0x2a   : > { %p3841_p5 = pnand %p4195_p4, %p3839_p3  ;;  %p3846_p13 = por %p3845_p10, %p3844_p7 }
  0x2c   : > { %p3842_p6 = pneg %p3841_p5  ;;  %p3848_p1 = por %p3847_p12, %p3846_p13 }
  0x2e   : > { %p3849_p2 = pnand %p3848_p1, %p3842_p6 }
  0x30   : > { %3852 = shalt.err (!%p3849_p2)
}
  0x31   : > { %s3853_s20 = scalar_lea.vmem %s4186_s12, 2048  ;;  %s4048_s22 = smov [#allocation5]  }
  0x32   : > { %p3854_p3 = scmp.ne.s32.totalorder %s4186_s12, %s3853_s20  ;;  %s3858_s21 = sshll.u32 %s4048_s22, 4  ;;  %s3859_s21 = int_to_ptr.vmem [resolvable:$false] %s3858_s21 }
  0x33   : > { %s3860_s18 = scalar_lea.vmem %s3859_s21, 4096  ;;  %p3861_p9 = scmp.lt.s32.totalorder %s4186_s12, %s3859_s21 }
  0x34   : > { %p3856_p5 = pnand %p3854_p3, %p4195_p4  ;;  %p3862_p8 = scmp.lt.s32.totalorder %s3860_s18, %s3853_s20 }
  0x36   : > { %p3857_p11 = pneg %p3856_p5  ;;  %p3863_p7 = por %p3862_p8, %p3861_p9 }
  0x38   : > { %p3864_p10 = pnand %p3863_p7, %p3857_p11 }
  0x3a   : > { %3867 = shalt.err (!%p3864_p10)
}
  0x3b   : > { %s5217_s9 = smov 128   ;;  %s5219_s23 = smov 8  }
  0x3c   : > { %3602 = dma.hbm_to_vmem [thread:$0]  (!%p4172_p0), %s4183_s8, 2048, %s4186_s12, %s4189_s11, %s5217_s9, %s5217_s9, %s5219_s23  }
  0x3d   : > { %p5243_p8 = scmp.lt.s32.totalorder %s4046_s29, 3  ;;  %p5244_p9 = scmp.ge.s32.totalorder %s4046_s29, 1 }
  0x3e   : > { %s5226_s20 = sshll.u32 %s4167_s17, 4  ;;  %s5246_s22 = sshll.u32 %s4042_s28, 11 }
  0x3f   : > { %p4226_p11 = pnand %p5244_p9, %p5243_p8  ;;  %s3145_s21 = sadd.s32 1792, %s5246_s22 }
  0x40   : > { %s5247_s1 = sld [smem:[#allocation22_spill]]  ;;  %s358_s8 = scalar_lea.vmem [#allocation2], %s5226_s20 }
  0x41   : > { %s5245_s10 = scalar_select %p4226_p11, 1, 0 }
  0x42   : > { %s381_s12 = sshll.u32 %s358_s8, 4  ;;  %s4245_s29 = scalar_lea.hbm %s5207_s3, %s3145_s21  ;;  %s4240_s12 = int_to_ptr.vmem [resolvable:$true] %s381_s12 }
  0x43   : > { %s355_s22 = scalar_lea.sflag [#allocation3], %s4167_s17 }
  0x46   : > { %s4236_s26 = scalar_lea.hbm %s5247_s1, %s3145_s21  ;;  %s3873_s16 = scalar_lea.hbm %s5247_s1, 4096 }
  0x47   : > { %s3868_s28 = scalar_lea.hbm %s4236_s26, 256  ;;  %p3874_p6 = scmp.lt.u32.totalorder %s4236_s26, %s5247_s1 }
  0x48   : > { %p3869_p12 = scmp.ne.s32.totalorder %s4236_s26, %s3868_s28  ;;  %p3875_p13 = scmp.lt.u32.totalorder %s3873_s16, %s3868_s28 }
  0x49   : > { %p3877_p5 = scmp.lt.u32.totalorder %s3868_s28, %s4236_s26 }
  0x4a   : > { %p3871_p1 = pnand %p3869_p12, %p4195_p4  ;;  %p3876_p3 = por %p3875_p13, %p3874_p6 }
  0x4c   : > { %p3872_p2 = pneg %p3871_p1  ;;  %p3878_p7 = por %p3877_p5, %p3876_p3 }
  0x4e   : > { %p3879_p10 = pnand %p3878_p7, %p3872_p2 }
  0x50   : > { %3882 = shalt.err (!%p3879_p10)
}
  0x51   : > { %s3883_s9 = scalar_lea.vmem %s4240_s12, 256  ;;  %s4051_s23 = smov [#allocation2]  }
  0x52   : > { %p3884_p8 = scmp.ne.s32.totalorder %s4240_s12, %s3883_s9  ;;  %s3888_s21 = sshll.u32 %s4051_s23, 4  ;;  %s3889_s21 = int_to_ptr.vmem [resolvable:$false] %s3888_s21 }
  0x53   : > { %s3890_s24 = scalar_lea.vmem %s3889_s21, 512  ;;  %p3891_p1 = scmp.lt.s32.totalorder %s4240_s12, %s3889_s21 }
  0x54   : > { %p3886_p9 = pnand %p3884_p8, %p4195_p4  ;;  %p3892_p11 = scmp.lt.s32.totalorder %s3890_s24, %s3883_s9 }
  0x56   : > { %p3887_p12 = pneg %p3886_p9  ;;  %p3893_p6 = por %p3892_p11, %p3891_p1 }
  0x58   : > { %p3894_p13 = pnand %p3893_p6, %p3887_p12 }
  0x5a   : > { %3897 = shalt.err (!%p3894_p13)
}
  0x5b   : > { %s5248_s28 = smov 8   ;;  %s5249_s16 = smov 128  }
  0x5c   : > { %3599 = dma.hbm_to_vmem [thread:$0]  (!%p4172_p0), %s4236_s26, 256, %s4240_s12, %s355_s22, %s5249_s16, %s5249_s16, %s5248_s28  }
  0x5d   : > { %s5250_s20 = sshll.u32 %s4167_s17, 4  ;;  %s3898_s18 = scalar_lea.hbm %s4245_s29, 256 }
  0x5e   : > { %s419_s8 = scalar_lea.vmem [#allocation7], %s5250_s20  ;;  %p3899_p11 = scmp.ne.s32.totalorder %s4245_s29, %s3898_s18 }
  0x5f   : > { %s442_s2 = sshll.u32 %s419_s8, 4  ;;  %s3903_s21 = scalar_lea.hbm %s5207_s3, 4096  ;;  %s4276_s2 = int_to_ptr.vmem [resolvable:$true] %s442_s2 }
  0x60   : > { %p3901_p2 = pnand %p3899_p11, %p4195_p4  ;;  %p3904_p5 = scmp.lt.u32.totalorder %s4245_s29, %s5207_s3 }
  0x61   : > { %p3905_p7 = scmp.lt.u32.totalorder %s3903_s21, %s3898_s18  ;;  %p3907_p8 = scmp.lt.u32.totalorder %s3898_s18, %s4245_s29 }
  0x62   : > { %p3902_p3 = pneg %p3901_p2 }
  0x63   : > { %p3906_p10 = por %p3905_p7, %p3904_p5 }
  0x65   : > { %p3908_p9 = por %p3907_p8, %p3906_p10 }
  0x67   : > { %p3909_p12 = pnand %p3908_p9, %p3902_p3 }
  0x69   : > { %3912 = shalt.err (!%p3909_p12)
}
  0x6a   : > { %s3913_s26 = scalar_lea.vmem %s4276_s2, 256  ;;  %s4052_s17 = smov [#allocation7]  }
  0x6b   : > { %p3914_p1 = scmp.ne.s32.totalorder %s4276_s2, %s3913_s26  ;;  %s3918_s12 = sshll.u32 %s4052_s17, 4  ;;  %s3919_s12 = int_to_ptr.vmem [resolvable:$false] %s3918_s12 }
  0x6c   : > { %s3920_s1 = scalar_lea.vmem %s3919_s12, 512  ;;  %p3921_p11 = scmp.lt.s32.totalorder %s4276_s2, %s3919_s12 }
  0x6d   : > { %p3916_p6 = pnand %p3914_p1, %p4195_p4  ;;  %p3922_p2 = scmp.lt.s32.totalorder %s3920_s1, %s3913_s26 }
  0x6f   : > { %p3917_p13 = pneg %p3916_p6  ;;  %p3923_p5 = por %p3922_p2, %p3921_p11 }
  0x71   : > { %p3924_p7 = pnand %p3923_p5, %p3917_p13 }
  0x73   : > { %3927 = shalt.err (!%p3924_p7)
}
  0x74   : > { %3605 = dma.hbm_to_vmem [thread:$0]  (!%p4172_p0), %s4245_s29, 256, %s4276_s2, %s4189_s11, %s5249_s16, %s5249_s16, %s5248_s28  }
  0x75   : > { %p5251_p4 = scmp.ne.s32.totalorder %s5245_s10, 0 }
  0x76   : > { %s4306_s15 = sand.u32 (!%p5251_p4), 1, %s4030_s25   ;;  %p5252_p3 = scmp.ne.s32.totalorder (!%p5251_p4), %s5235_s13, 0 }
  0x77   : > { %480 = sbr.rel (%p5251_p4) target bundleno = 1146 (0x47a), region = 44  ;;  %s3055_s22 = sshll.u32 (!%p5251_p4), %s4306_s15, 4 }
  0x78   : > { %s483_s20 = scalar_lea.sflag (!%p5251_p4), [#allocation3], %s4306_s15  ;;  %s486_s19 = scalar_lea.vmem (!%p5251_p4), [#allocation2], %s3055_s22 }
  0x7e   : > { %4009 = dma.done.wait (%p5252_p3), %s483_s20, 256  }
  0x7f   : > { %4011 = vsyncadd (%p5252_p3), %s483_s20, 4294967040  ;;  %s491_s29 = sand.u32 1, %s4129_s30   ;;  %s3056_s11 = sshll.u32 %s4306_s15, 7 }
  0x80   : > { %s492_s10 = scalar_lea.sflag [#allocation6], %s491_s29  ;;  %s4320_s28 = scalar_lea.vmem [#allocation5], %s3056_s11 }
  0x81   : > { %4013 = dma.done.wait (%p5252_p3), %s492_s10, 2304  }
  0x82   : > { %4015 = vsyncadd (%p5252_p3), %s492_s10, 4294964992  ;;  %p579_p0 = scmp.lt.s32.totalorder %s4038_s27, 1  ;;  %vm715_vm0 = vcmask 261120   ;;  %v4358_v8 = vld [vmem:[%s486_s19 + $0x8] sm:$0xff]  ;;  %v4360_v9 = vld [vmem:[%s486_s19] sm:$0xff]  ;;  %v4053_v56 = vmov 0  }
  0x83   : > { %v925_v14 = vmul.f32 %v4358_v8, %v4358_v8  ;;  %v924_v15 = vmul.f32 %v4360_v9, %v4360_v9  ;;  %3669 = vset.pattern.permute.xlu1 %v4053_v56  ;;  %3668 = vset.pattern.permute.xlu0 %v4053_v56  ;;  %s504_s12 = scalar_lea.vmem [#allocation7], %s3055_s22  ;;  %s3059_s1 = sshll.u32 %s4306_s15, 3 }
  0x84   : > { %s4328_s16 = scalar_select %p579_p0, %s4038_s27, 1 }
  0x85   : > { %v929_v18 = vsel %vm715_vm0, %v925_v14, 0.0  ;;  %v926_v19 = vsel %vm715_vm0, %v924_v15, 0.0  ;;  %s577_s22 = scalar_lea.vmem [#allocation9], %s3059_s1  ;;  %s3141_s20 = sshll.u32 %s4038_s27, 7 }
  0x86   : > { %s3149_s8 = sshll.u32 %s4328_s16, 7  ;;  %s3064_s21 = sshll.u32 %s4328_s16, 3 }
  0x87   : > { %s4336_s18 = scalar_lea.vmem %s5204_s0, %s3149_s8  ;;  %s4453_s23 = scalar_lea.vmem %s5208_s4, %s3149_s8 }
  0x88   : > { %v4339_v0 = vld [vmem:[%s4336_s18 + $0x10] sm:$0xff]  ;;  %v4342_v1 = vld [vmem:[%s4336_s18] sm:$0xff]  ;;  %v4345_v2 = vld [vmem:[%s4336_s18 + $0x18] sm:$0xff]  ;;  %s4760_s17 = scalar_lea.vmem %s5209_s5, %s3064_s21  ;;  %s2818_s19 = sshll.u32 %s577_s22, 4  ;;  %s2819_s19 = int_to_ptr.vmem [resolvable:$true] %s2818_s19 }
  0x89   : > { %v701_v3 = vmul.f32 %v4339_v0, %v4339_v0  ;;  %v699_v4 = vmul.f32 %v4342_v1, %v4342_v1  ;;  %v702_v5 = vmul.f32 %v4345_v2, %v4345_v2  ;;  %v4354_v6 = vld [vmem:[%s4336_s18 + $0x8] sm:$0xff]  ;;  %v4374_v17 = vld [vmem:[%s4336_s18 + $0x20] sm:$0xff]  ;;  %v4383_v22 = vld [vmem:[%s4336_s18 + $0x38] sm:$0xff]  ;;  %v952_v54 = vmul.f32 0.17677669, %v4342_v1  ;;  %s2785_s16 = scalar_lea.sflag [#allocation10], %s4306_s15 }
  0x8a   : > { %v700_v7 = vmul.f32 %v4354_v6, %v4354_v6  ;;  %v4371_v16 = vld [vmem:[%s4336_s18 + $0x28] sm:$0xff]  ;;  %v703_v21 = vmul.f32 %v4374_v17, %v4374_v17  ;;  %v4386_v23 = vld [vmem:[%s4336_s18 + $0x30] sm:$0xff]  ;;  %v706_v26 = vmul.f32 %v4383_v22, %v4383_v22  ;;  %v4398_v29 = vld [vmem:[%s4336_s18 + $0x40] sm:$0xff]  ;;  %v954_v55 = vmul.f32 0.17677669, %v4339_v0  ;;  %s3928_s8 = scalar_lea.vmem %s2819_s19, 128 }
  0x8b   : > { %v722_v10 = vsel %vm715_vm0, %v701_v3, 0.0  ;;  %v716_v11 = vsel %vm715_vm0, %v699_v4, 0.0  ;;  %v725_v12 = vsel %vm715_vm0, %v702_v5, 0.0  ;;  %v704_v20 = vmul.f32 %v4371_v16, %v4371_v16  ;;  %v4395_v28 = vld [vmem:[%s4336_s18 + $0x48] sm:$0xff]  ;;  %v4407_v34 = vld [vmem:[%s4336_s18 + $0x58] sm:$0xff]  ;;  %v4410_v35 = vld [vmem:[%s4336_s18 + $0x50] sm:$0xff]  ;;  %3258 = vmatprep.mubr.msk.f32.mxu0 %vm715_vm0, %v952_v54  ;;  %p3929_p10 = scmp.ne.s32.totalorder %s2819_s19, %s3928_s8 }
  0x8c   : > { %723 = vadd.xlane.f32.xlu1 %v722_v10  ;;  %717 = vadd.xlane.f32.xlu0 %v716_v11  ;;  %v719_v13 = vsel %vm715_vm0, %v700_v7, 0.0  ;;  %v728_v25 = vsel %vm715_vm0, %v703_v21, 0.0  ;;  %v705_v27 = vmul.f32 %v4386_v23, %v4386_v23  ;;  %v737_v30 = vsel %vm715_vm0, %v706_v26, 0.0  ;;  %v4419_v40 = vld [vmem:[%s4336_s18 + $0x68] sm:$0xff]  ;;  %v4422_v41 = vld [vmem:[%s4336_s18 + $0x60] sm:$0xff]  ;;  %v4431_v46 = vld [vmem:[%s4336_s18 + $0x78] sm:$0xff] }
  0x8d   : > { %v731_v24 = vsel %vm715_vm0, %v704_v20, 0.0  ;;  %v708_v32 = vmul.f32 %v4395_v28, %v4395_v28  ;;  %v707_v33 = vmul.f32 %v4398_v29, %v4398_v29  ;;  %v710_v38 = vmul.f32 %v4407_v34, %v4407_v34  ;;  %v4434_v47 = vld [vmem:[%s4336_s18 + $0x70] sm:$0xff]  ;;  %3269 = vmatprep.mubr.msk.f32.mxu1 %vm715_vm0, %v954_v55  ;;  %v676_v58 = vld [vmem:[%s4453_s23 + $0x8] sm:$0xff]  ;;  %v675_v59 = vld [vmem:[%s4453_s23] sm:$0xff]  ;;  %p5255_p8 = scmp.ne.s32.totalorder %s5236_s14, 0  ;;  %s4054_s30 = smov [#allocation9]  }
  0x8e   : > { %v734_v31 = vsel %vm715_vm0, %v705_v27, 0.0  ;;  %v709_v39 = vmul.f32 %v4410_v35, %v4410_v35  ;;  %v712_v44 = vmul.f32 %v4419_v40, %v4419_v40  ;;  %v711_v45 = vmul.f32 %v4422_v41, %v4422_v41  ;;  %v677_v57 = vld [vmem:[%s4453_s23 + $0x10] sm:$0xff]  ;;  %v678_v61 = vld [vmem:[%s4453_s23 + $0x18] sm:$0xff]  ;;  %v679_v63 = vld [vmem:[%s4453_s23 + $0x20] sm:$0xff]  ;;  %s3932_s2 = sshll.u32 %s4054_s30, 4  ;;  %s3933_s2 = int_to_ptr.vmem [resolvable:$false] %s3932_s2 }
  0x8f   : > { %v743_v36 = vsel %vm715_vm0, %v708_v32, 0.0  ;;  %v740_v37 = vsel %vm715_vm0, %v707_v33, 0.0  ;;  %v749_v42 = vsel %vm715_vm0, %v710_v38, 0.0  ;;  %v714_v50 = vmul.f32 %v4431_v46, %v4431_v46  ;;  %v685_v60 = vld [vmem:[%s4453_s23 + $0x50] sm:$0xff]  ;;  %v686_v62 = vld [vmem:[%s4453_s23 + $0x58] sm:$0xff]  ;;  %v680_v7 = vld [vmem:[%s4453_s23 + $0x28] sm:$0xff]  ;;  %p3930_p9 = pnand %p3929_p10, %p5255_p8  ;;  %p3935_p1 = scmp.lt.s32.totalorder %s2819_s19, %s3933_s2 }
  0x90   : > { %726 = vadd.xlane.f32.xlu1 %v725_v12  ;;  %720 = vadd.xlane.f32.xlu0 %v719_v13  ;;  %v746_v43 = vsel %vm715_vm0, %v709_v39, 0.0  ;;  %v755_v48 = vsel %vm715_vm0, %v712_v44, 0.0  ;;  %v752_v49 = vsel %vm715_vm0, %v711_v45, 0.0  ;;  %v713_v51 = vmul.f32 %v4434_v47, %v4434_v47  ;;  %v689_v3 = vld [vmem:[%s4453_s23 + $0x70] sm:$0xff]  ;;  %v690_v5 = vld [vmem:[%s4453_s23 + $0x78] sm:$0xff]  ;;  %v683_v13 = vld [vmem:[%s4453_s23 + $0x40] sm:$0xff] }
  0x91   : > { %v761_v52 = vsel %vm715_vm0, %v714_v50, 0.0  ;;  %v681_v4 = vld [vmem:[%s4453_s23 + $0x30] sm:$0xff]  ;;  %v682_v10 = vld [vmem:[%s4453_s23 + $0x38] sm:$0xff]  ;;  %v688_v44 = vld [vmem:[%s4453_s23 + $0x68] sm:$0xff]  ;;  %p3931_p12 = pneg %p3930_p9  ;;  %s3934_s18 = scalar_lea.vmem %s3933_s2, 256 }
  0x92   : > { %v758_v53 = vsel %vm715_vm0, %v713_v51, 0.0  ;;  %p3936_p6 = scmp.lt.s32.totalorder %s3934_s18, %s3928_s8 }
  0x94   : > { %930 = vadd.xlane.f32.xlu1 %v929_v18  ;;  %927 = vadd.xlane.f32.xlu0 %v926_v19  ;;  %v684_v18 = vld [vmem:[%s4453_s23 + $0x48] sm:$0xff]  ;;  %p3937_p13 = por %p3936_p6, %p3935_p1 }
  0x96   : > { %p3938_p11 = pnand %p3937_p13, %p3931_p12 }
  0x98   : > { %732 = vadd.xlane.f32.xlu1 %v731_v24  ;;  %729 = vadd.xlane.f32.xlu0 %v728_v25  ;;  %v687_v25 = vld [vmem:[%s4453_s23 + $0x60] sm:$0xff] }
  0x9c   : > { %738 = vadd.xlane.f32.xlu1 %v737_v30  ;;  %735 = vadd.xlane.f32.xlu0 %v734_v31 }
  0xa0   : > { %744 = vadd.xlane.f32.xlu1 %v743_v36  ;;  %741 = vadd.xlane.f32.xlu0 %v740_v37 }
  0xa4   : > { %750 = vadd.xlane.f32.xlu1 %v749_v42  ;;  %747 = vadd.xlane.f32.xlu0 %v746_v43 }
  0xa8   : > { %756 = vadd.xlane.f32.xlu1 %v755_v48  ;;  %753 = vadd.xlane.f32.xlu0 %v752_v49 }
  0xac   : > { %762 = vadd.xlane.f32.xlu1 %v761_v52  ;;  %759 = vadd.xlane.f32.xlu0 %v758_v53 }
  0xbd   : > { %1677 = vperm.xlu1 %3669, %v677_v57  }
  0xc1   : > { %1674 = vperm.xlu1 %3669, %v676_v58  }
  0xc2   : > { %1671 = vperm.xlu0 %3668, %v675_v59  }
  0xc5   : > { %1680 = vperm.xlu1 %3669, %v678_v61  }
  0xc6   : > { %1701 = vperm.xlu0 %3668, %v685_v60  }
  0xc9   : > { %1683 = vperm.xlu1 %3669, %v679_v63  }
  0xca   : > { %1704 = vperm.xlu0 %3668, %v686_v62  }
  0xcd   : > { %1689 = vperm.xlu1 %3669, %v681_v4  }
  0xce   : > { %1713 = vperm.xlu0 %3668, %v689_v3  }
  0xd1   : > { %1686 = vperm.xlu1 %3669, %v680_v7  }
  0xd2   : > { %1716 = vperm.xlu0 %3668, %v690_v5  }
  0xd5   : > { %1692 = vperm.xlu1 %3669, %v682_v10  }
  0xd9   : > { %1695 = vperm.xlu1 %3669, %v683_v13  }
  0xdd   : > { %1698 = vperm.xlu1 %3669, %v684_v18  }
  0xe1   : > { %1707 = vperm.xlu1 %3669, %v687_v25  }
  0xe5   : > { %1710 = vperm.xlu1 %3669, %v688_v44  }
 0x119   : > { %v724_v11 = vpop.xlane.xlu1 %723  ;;  %v718_v12 = vpop.xlane.xlu0 %717 }
 0x11a   : > { %3670 = vrsqrt.f32 %v724_v11  ;;  %vm780_vm1 = vcmp.eq.f32.partialorder %v724_v11, inf  ;;  %vm782_vm2 = vcmp.eq.f32.partialorder %v724_v11, 0.0  ;;  %v783_v24 = vand.u32 2147483648, %v724_v11 }
 0x11b   : > { %3672 = vrsqrt.f32 %v718_v12  ;;  %vm766_vm3 = vcmp.eq.f32.partialorder %v718_v12, inf  ;;  %vm768_vm4 = vcmp.eq.f32.partialorder %v718_v12, 0.0  ;;  %v769_v30 = vand.u32 2147483648, %v718_v12 }
 0x11d   : > { %v727_v14 = vpop.xlane.xlu1 %726  ;;  %v721_v15 = vpop.xlane.xlu0 %720 }
 0x11e   : > { %3674 = vrsqrt.f32 %v727_v14  ;;  %vm787_vm5 = vcmp.eq.f32.partialorder %v727_v14, inf  ;;  %vm789_vm6 = vcmp.eq.f32.partialorder %v727_v14, 0.0  ;;  %v790_v37 = vand.u32 2147483648, %v727_v14 }
 0x11f   : > { %3676 = vrsqrt.f32 %v721_v15  ;;  %vm773_vm7 = vcmp.eq.f32.partialorder %v721_v15, inf  ;;  %vm775_vm8 = vcmp.eq.f32.partialorder %v721_v15, 0.0  ;;  %v776_v43 = vand.u32 2147483648, %v721_v15 }
 0x121   : > { %v4469_v19 = vpop.xlane.xlu1 %930  ;;  %v4471_v20 = vpop.xlane.xlu0 %927 }
 0x122   : > { %3678 = vrsqrt.f32 %v4469_v19  ;;  %vm941_vm9 = vcmp.eq.f32.partialorder %v4469_v19, inf  ;;  %vm943_vm10 = vcmp.eq.f32.partialorder %v4469_v19, 0.0  ;;  %v944_v56 = vand.u32 2147483648, %v4469_v19 }
 0x123   : > { %3680 = vrsqrt.f32 %v4471_v20  ;;  %vm934_vm11 = vcmp.eq.f32.partialorder %v4471_v20, inf  ;;  %vm936_vm12 = vcmp.eq.f32.partialorder %v4471_v20, 0.0  ;;  %v937_v60 = vand.u32 2147483648, %v4471_v20 }
 0x124   : > { %v3671_v21 = vpop.eup %3670 }
 0x125   : > { %v3673_v26 = vpop.eup %3672  ;;  %v779_v27 = vmul.f32 %v3671_v21, %v724_v11  ;;  %v4476_v31 = vpop.xlane.xlu1 %732 }
 0x126   : > { %v4478_v32 = vpop.xlane.xlu0 %729  ;;  %v765_v33 = vmul.f32 %v3673_v26, %v718_v12  ;;  %3682 = vrsqrt.f32 %v4476_v31  ;;  %vm801_vm13 = vcmp.eq.f32.partialorder %v4476_v31, inf  ;;  %vm803_vm14 = vcmp.eq.f32.partialorder %v4476_v31, 0.0 }
 0x127   : > { %v781_v36 = vsel %vm780_vm1, %v724_v11, %v779_v27  ;;  %3684 = vrsqrt.f32 %v4478_v32  ;;  %vm794_vm15 = vcmp.eq.f32.partialorder %v4478_v32, inf  ;;  %vm796_vm1 = vcmp.eq.f32.partialorder %v4478_v32, 0.0 }
 0x128   : > { %v3675_v38 = vpop.eup %3674  ;;  %v784_v39 = vsel %vm782_vm2, %v783_v24, %v781_v36  ;;  %v767_v42 = vsel %vm766_vm3, %v718_v12, %v765_v33  ;;  %v804_v12 = vand.u32 2147483648, %v4476_v31 }
 0x129   : > { %v3677_v45 = vpop.eup %3676  ;;  %v878_v48 = vmax.f32 %v784_v39, 1e-12  ;;  %v770_v49 = vsel %vm768_vm4, %v769_v30, %v767_v42  ;;  %v786_v50 = vmul.f32 %v3675_v38, %v727_v14  ;;  %v4487_v51 = vpop.xlane.xlu1 %738 }
 0x12a   : > { %v4489_v52 = vpop.xlane.xlu0 %735  ;;  %v876_v53 = vmax.f32 %v770_v49, 1e-12  ;;  %v772_v54 = vmul.f32 %v3677_v45, %v721_v15  ;;  %3686 = vrsqrt.f32 %v4487_v51  ;;  %vm815_vm2 = vcmp.eq.f32.partialorder %v4487_v51, inf }
 0x12b   : > { %v788_v55 = vsel %vm787_vm5, %v727_v14, %v786_v50  ;;  %3688 = vrcp.f32 %v878_v48  ;;  %vm817_vm3 = vcmp.eq.f32.partialorder %v4487_v51, 0.0  ;;  %v818_v49 = vand.u32 2147483648, %v4487_v51 }
 0x12c   : > { %v3679_v57 = vpop.eup %3678  ;;  %v791_v58 = vsel %vm789_vm6, %v790_v37, %v788_v55  ;;  %v774_v59 = vsel %vm773_vm7, %v721_v15, %v772_v54  ;;  %3690 = vrsqrt.f32 %v4489_v52  ;;  %vm808_vm4 = vcmp.eq.f32.partialorder %v4489_v52, inf }
 0x12d   : > { %v3681_v61 = vpop.eup %3680  ;;  %v879_v62 = vmax.f32 %v791_v58, 1e-12  ;;  %v777_v63 = vsel %vm775_vm8, %v776_v43, %v774_v59  ;;  %v940_v3 = vmul.f32 %v3679_v57, %v4469_v19  ;;  %v4503_v4 = vpop.xlane.xlu1 %744  ;;  %3692 = vrcp.f32 %v876_v53 }
 0x12e   : > { %v4505_v5 = vpop.xlane.xlu0 %741  ;;  %v877_v7 = vmax.f32 %v777_v63, 1e-12  ;;  %v933_v10 = vmul.f32 %v3681_v61, %v4471_v20  ;;  %vm810_vm5 = vcmp.eq.f32.partialorder %v4489_v52, 0.0  ;;  %v811_v50 = vand.u32 2147483648, %v4489_v52 }
 0x12f   : > { %3694 = vrcp.f32 %v879_v62  ;;  %v942_v11 = vsel %vm941_vm9, %v4469_v19, %v940_v3  ;;  %vm829_vm6 = vcmp.eq.f32.partialorder %v4503_v4, inf  ;;  %vm831_vm7 = vcmp.eq.f32.partialorder %v4503_v4, 0.0 }
 0x130   : > { %v3683_v13 = vpop.eup %3682  ;;  %3696 = vrcp.f32 %v877_v7  ;;  %v945_v14 = vsel %vm943_vm10, %v944_v56, %v942_v11  ;;  %v935_v15 = vsel %vm934_vm11, %v4471_v20, %v933_v10  ;;  %v797_v20 = vand.u32 2147483648, %v4478_v32  ;;  %vm4581_vm11 = vmpackc.low %vm715_vm0, %vm715_vm0 }
 0x131   : > { %v3685_v18 = vpop.eup %3684  ;;  %v947_v21 = vmax.f32 %v945_v14, 1e-12  ;;  %v938_v24 = vsel %vm936_vm12, %v937_v60, %v935_v15  ;;  %v800_v25 = vmul.f32 %v3683_v13, %v4476_v31  ;;  %3698 = vrsqrt.f32 %v4503_v4  ;;  %v4524_v26 = vpop.xlane.xlu1 %750 }
 0x132   : > { %v946_v27 = vmax.f32 %v938_v24, 1e-12  ;;  %v793_v19 = vmul.f32 %v3685_v18, %v4478_v32  ;;  %3700 = vrsqrt.f32 %v4505_v5  ;;  %v4534_v33 = vpop.xlane.xlu0 %747  ;;  %v832_v59 = vand.u32 2147483648, %v4503_v4 }
 0x133   : > { %3702 = vrcp.f32 %v947_v21  ;;  %v802_v30 = vsel %vm801_vm13, %v4476_v31, %v800_v25  ;;  %vm822_vm8 = vcmp.eq.f32.partialorder %v4505_v5, inf  ;;  %vm824_vm9 = vcmp.eq.f32.partialorder %v4505_v5, 0.0 }
 0x134   : > { %v3687_v36 = vpop.eup %3686  ;;  %3704 = vrcp.f32 %v946_v27  ;;  %v805_v37 = vsel %vm803_vm14, %v804_v12, %v802_v30  ;;  %v795_v38 = vsel %vm794_vm15, %v4478_v32, %v793_v19  ;;  %v825_v3 = vand.u32 2147483648, %v4505_v5 }
 0x135   : > { %v881_v39 = vmax.f32 %v805_v37, 1e-12  ;;  %v798_v42 = vsel %vm796_vm1, %v797_v20, %v795_v38  ;;  %v814_v43 = vmul.f32 %v3687_v36, %v4487_v51  ;;  %3706 = vrsqrt.f32 %v4524_v26  ;;  %v4544_v44 = vpop.xlane.xlu1 %756  ;;  %v3689_v45 = vpop.eup %3688 }
 0x136   : > { %v880_v48 = vmax.f32 %v798_v42, 1e-12  ;;  %3708 = vrsqrt.f32 %v4534_v33  ;;  %v3691_v31 = vpop.eup %3690  ;;  %v4554_v53 = vpop.xlane.xlu0 %753  ;;  %vm843_vm10 = vcmp.eq.f32.partialorder %v4524_v26, inf  ;;  %v897_v18 = vmul.f32 %v3689_v45, %v4339_v0 }
 0x137   : > { %3710 = vrcp.f32 %v881_v39  ;;  %v816_v32 = vsel %vm815_vm2, %v4487_v51, %v814_v43  ;;  %v3693_v54 = vpop.eup %3692  ;;  %v807_v56 = vmul.f32 %v3691_v31, %v4489_v52  ;;  %vm845_vm12 = vcmp.eq.f32.partialorder %v4524_v26, 0.0 }
 0x138   : > { %3712 = vrcp.f32 %v880_v48  ;;  %v819_v55 = vsel %vm817_vm3, %v818_v49, %v816_v32  ;;  %v893_v12 = vmul.f32 %v3693_v54, %v4342_v1  ;;  %v846_v20 = vand.u32 2147483648, %v4524_v26 }
 0x139   : > { %v3695_v57 = vpop.eup %3694  ;;  %v883_v58 = vmax.f32 %v819_v55, 1e-12  ;;  %3714 = vrsqrt.f32 %v4544_v44  ;;  %v809_v61 = vsel %vm808_vm4, %v4489_v52, %v807_v56  ;;  %v4569_v51 = vpop.xlane.xlu1 %762  ;;  %vm836_vm13 = vcmp.eq.f32.partialorder %v4534_v33, inf }
 0x13a   : > { %v3697_v60 = vpop.eup %3696  ;;  %3716 = vrsqrt.f32 %v4554_v53  ;;  %v812_v63 = vsel %vm810_vm5, %v811_v50, %v809_v61  ;;  %v899_v21 = vmul.f32 %v3695_v57, %v4345_v2  ;;  %v4592_v27 = vpop.xlane.xlu0 %759  ;;  %v839_v42 = vand.u32 2147483648, %v4534_v33 }
 0x13b   : > { %v3699_v62 = vpop.eup %3698  ;;  %3718 = vrcp.f32 %v883_v58  ;;  %v882_v10 = vmax.f32 %v812_v63, 1e-12  ;;  %v895_v13 = vmul.f32 %v3697_v60, %v4354_v6  ;;  %vm838_vm14 = vcmp.eq.f32.partialorder %v4534_v33, 0.0 }
 0x13c   : > { %v3701_v7 = vpop.eup %3700  ;;  %v828_v11 = vmul.f32 %v3699_v62, %v4503_v4  ;;  %3720 = vrsqrt.f32 %v4569_v51  ;;  %v4600_v36 = vpack.c.bf16 %v899_v21, %v897_v18  ;;  %vm857_vm15 = vcmp.eq.f32.partialorder %v4544_v44, inf }
 0x13d   : > { %v3703_v14 = vpop.eup %3702  ;;  %v821_v15 = vmul.f32 %v3701_v7, %v4505_v5  ;;  %3722 = vrcp.f32 %v882_v10  ;;  %v3426_v25 = vpack.c.bf16 %v895_v13, %v893_v12  ;;  %vm850_vm1 = vcmp.eq.f32.partialorder %v4554_v53, inf }
 0x13e   : > { %v3705_v24 = vpop.eup %3704  ;;  %v830_v1 = vsel %vm829_vm6, %v4503_v4, %v828_v11  ;;  %3440 = vmatprep.subr.msk.bf16.mxu1 %vm4581_vm11, %v4600_v36  ;;  %3724 = vrsqrt.f32 %v4592_v27  ;;  %v951_v58 = vmul.f32 %v3703_v14, %v4358_v8  ;;  %v953_v12 = vmul.f32 0.17677669, %v4354_v6 }
 0x13f   : > { %v3707_v19 = vpop.eup %3706  ;;  %v833_v30 = vsel %vm831_vm7, %v832_v59, %v830_v1  ;;  %v823_v0 = vsel %vm822_vm8, %v4505_v5, %v821_v15  ;;  %3428 = vmatprep.subr.msk.bf16.mxu0 %vm4581_vm11, %v3426_v25  ;;  %3443 = vmatpush3.bf16.xpose.msk.msra.mxu1 %vm4581_vm11, %v4600_v36  ;;  %v949_v54 = vmul.f32 %v3705_v24, %v4360_v9  ;;  %vm859_vm2 = vcmp.eq.f32.partialorder %v4544_v44, 0.0 }
 0x140   : > { %v3709_v37 = vpop.eup %3708  ;;  %v826_v38 = vsel %vm824_vm9, %v825_v3, %v823_v0  ;;  %v842_v39 = vmul.f32 %v3707_v19, %v4524_v26  ;;  %v885_v43 = vmax.f32 %v833_v30, 1e-12  ;;  %3431 = vmatpush3.bf16.xpose.msk.msra.mxu0 %vm4581_vm11, %v3426_v25  ;;  %3446 = vmatprep.subr.msk.bf16.mxu1 %vm4581_vm11, %v3426_v25  ;;  %v860_v13 = vand.u32 2147483648, %v4544_v44 }
 0x141   : > { %v3711_v4 = vpop.eup %3710  ;;  %v835_v45 = vmul.f32 %v3709_v37, %v4534_v33  ;;  %v884_v48 = vmax.f32 %v826_v38, 1e-12  ;;  %v3432_v62 = vpack.c.bf16 %v951_v58, %v949_v54  ;;  %vm871_vm3 = vcmp.eq.f32.partialorder %v4569_v51, inf }
 0x142   : > { %v3713_v5 = vpop.eup %3712  ;;  %v844_v49 = vsel %vm843_vm10, %v4524_v26, %v842_v39  ;;  %3726 = vrcp.f32 %v885_v43  ;;  %v903_v61 = vmul.f32 %v3711_v4, %v4371_v16  ;;  %v853_v18 = vand.u32 2147483648, %v4554_v53 }
 0x143   : > { %v3715_v31 = vpop.eup %3714  ;;  %v847_v32 = vsel %vm845_vm12, %v846_v20, %v844_v49  ;;  %v837_v50 = vsel %vm836_vm13, %v4534_v33, %v835_v45  ;;  %v901_v26 = vmul.f32 %v3713_v5, %v4374_v17  ;;  %3728 = vrcp.f32 %v884_v48  ;;  %3434 = vmatprep.subr.msk.bf16.mxu0 %vm4581_vm11, %v3432_v62 }
 0x144   : > { %v3717_v55 = vpop.eup %3716  ;;  %v887_v56 = vmax.f32 %v847_v32, 1e-12  ;;  %v840_v57 = vsel %vm838_vm14, %v839_v42, %v837_v50  ;;  %v856_v63 = vmul.f32 %v3715_v31, %v4544_v44  ;;  %vm864_vm4 = vcmp.eq.f32.partialorder %v4592_v27, inf }
 0x145   : > { %v3719_v59 = vpop.eup %3718  ;;  %v886_v60 = vmax.f32 %v840_v57, 1e-12  ;;  %v849_v8 = vmul.f32 %v3717_v55, %v4554_v53  ;;  %v3450_v7 = vpack.c.bf16 %v903_v61, %v901_v26  ;;  %vm852_vm5 = vcmp.eq.f32.partialorder %v4554_v53, 0.0 }
 0x146   : > { %v3721_v33 = vpop.eup %3720  ;;  %3730 = vrcp.f32 %v887_v56  ;;  %v907_v9 = vmul.f32 %v3719_v59, %v4383_v22  ;;  %v858_v15 = vsel %vm857_vm15, %v4544_v44, %v856_v63  ;;  %v874_v24 = vand.u32 2147483648, %v4569_v51 }
 0x147   : > { %v3723_v3 = vpop.eup %3722  ;;  %3732 = vrcp.f32 %v886_v60  ;;  %v870_v10 = vmul.f32 %v3721_v33, %v4569_v51  ;;  %3449 = vmatpush3.bf16.xpose.msk.msra.mxu1 %vm4581_vm11, %v3426_v25  ;;  %v851_v21 = vsel %vm850_vm1, %v4554_v53, %v849_v8  ;;  %v955_v25 = vmul.f32 0.17677669, %v4345_v2 }
 0x148   : > { %3437 = vmatpush3.bf16.xpose.msk.msra.mxu0 %vm4581_vm11, %v3432_v62  ;;  %v905_v11 = vmul.f32 %v3723_v3, %v4386_v23  ;;  %v3725_v14 = vpop.eup %3724  ;;  %vm873_vm6 = vcmp.eq.f32.partialorder %v4569_v51, 0.0  ;;  %v867_v30 = vand.u32 2147483648, %v4592_v27  ;;  %v861_v0 = vsel %vm859_vm2, %v860_v13, %v858_v15  ;;  %v3114_v3 = vld [vmem:[%s4760_s17 + $0x1] ss:$0 sm:$0xff] }
 0x149   : > { %3452 = vmatprep.subr.msk.bf16.mxu0 %vm4581_vm11, %v3450_v7  ;;  %v863_v1 = vmul.f32 %v3725_v14, %v4592_v27  ;;  %v872_v19 = vsel %vm871_vm3, %v4569_v51, %v870_v10  ;;  %vm866_vm7 = vcmp.eq.f32.partialorder %v4592_v27, 0.0  ;;  %v956_v2 = vmul.f32 0.17677669, %v4374_v17 }
 0x14a   : > { %v4656_v6 = vpack.c.bf16 %v907_v9, %v905_v11  ;;  %v854_v37 = vsel %vm852_vm5, %v853_v18, %v851_v21  ;;  %v958_v51 = vmul.f32 0.17677669, %v4386_v23  ;;  %v875_v39 = vsel %vm873_vm6, %v874_v24, %v872_v19  ;;  %v3113_v9 = vld [vmem:[%s4760_s17] ss:$0 sm:$0xff]  ;;  %v3115_v19 = vld [vmem:[%s4760_s17 + $0x2] ss:$0 sm:$0xff] }
 0x14b   : > { %v865_v53 = vsel %vm864_vm4, %v4592_v27, %v863_v1  ;;  %v889_v4 = vmax.f32 %v861_v0, 1e-12  ;;  %v888_v27 = vmax.f32 %v854_v37, 1e-12  ;;  %v891_v17 = vmax.f32 %v875_v39, 1e-12 }
 0x14c   : > { %3464 = vmatprep.subr.msk.bf16.mxu1 %vm4581_vm11, %v4656_v6  ;;  %v3727_v20 = vpop.eup %3726  ;;  %v868_v43 = vsel %vm866_vm7, %v867_v30, %v865_v53  ;;  %v957_v50 = vmul.f32 0.17677669, %v4371_v16  ;;  %v959_v54 = vmul.f32 0.17677669, %v4383_v22  ;;  %v960_v56 = vmul.f32 0.17677669, %v4398_v29 }
 0x14d   : > { %v3729_v38 = vpop.eup %3728  ;;  %v890_v23 = vmax.f32 %v868_v43, 1e-12  ;;  %v911_v5 = vmul.f32 %v3727_v20, %v4395_v28  ;;  %3734 = vrcp.f32 %v889_v4  ;;  %v961_v61 = vmul.f32 0.17677669, %v4395_v28  ;;  %v3116_v30 = vld [vmem:[%s4760_s17 + $0x3] ss:$0 sm:$0xff] }
 0x14e   : > { %3270 = vmatmul.mubr.msk.f32.vlgmr.msra.gmra.mrb[0].mxu1 %vm715_vm0, %v955_v25  ;;  %v909_v45 = vmul.f32 %v3729_v38, %v4398_v29  ;;  %3736 = vrcp.f32 %v888_v27  ;;  %v963_v62 = vmul.f32 0.17677669, %v4407_v34  ;;  %v964_v33 = vmul.f32 0.17677669, %v4422_v41 }
 0x14f   : > { %3259 = vmatmul.mubr.msk.f32.vlgmr.msra.gmra.mrb[0].mxu0 %vm715_vm0, %v953_v12  ;;  %3467 = vmatpush3.bf16.xpose.msk.msra.mxu1 %vm4581_vm11, %v4656_v6  ;;  %3738 = vrcp.f32 %v891_v17  ;;  %v966_v63 = vmul.f32 0.17677669, %v4434_v47  ;;  %v965_v28 = vmul.f32 0.17677669, %v4419_v40 }
 0x150   : > { %v3731_v42 = vpop.eup %3730  ;;  %3455 = vmatpush3.bf16.xpose.msk.msra.mxu0 %vm4581_vm11, %v3450_v7  ;;  %3470 = vmatprep.subr.msk.bf16.mxu1 %vm4581_vm11, %v3450_v7  ;;  %3740 = vrcp.f32 %v890_v23  ;;  %v3474_v31 = vpack.c.bf16 %v911_v5, %v909_v45  ;;  %v3117_v45 = vld [vmem:[%s4760_s17 + $0x4] ss:$0 sm:$0xff]  ;;  %v3118_v5 = vld [vmem:[%s4760_s17 + $0x5] ss:$0 sm:$0xff] }
 0x151   : > { %v3733_v44 = vpop.eup %3732  ;;  %3458 = vmatprep.subr.msk.bf16.mxu0 %vm4581_vm11, %v4600_v36  ;;  %3280 = vmatprep.mubr.msk.f32.mxu0 %vm715_vm0, %v956_v2  ;;  %v915_v49 = vmul.f32 %v3731_v42, %v4407_v34  ;;  %v967_v34 = vmul.f32 0.17677669, %v4431_v46 }
 0x152   : > { %3291 = vmatprep.mubr.msk.f32.mxu1 %vm715_vm0, %v958_v51  ;;  %v913_v48 = vmul.f32 %v3733_v44, %v4410_v35 }
 0x154   : > { %v3486_v32 = vpack.c.bf16 %v915_v49, %v913_v48 }
 0x157   : > { %3473 = vmatpush3.bf16.xpose.msk.msra.mxu1 %vm4581_vm11, %v3450_v7  ;;  %v3735_v55 = vpop.eup %3734 }
 0x158   : > { %3461 = vmatpush3.bf16.xpose.msk.msra.mxu0 %vm4581_vm11, %v4600_v36  ;;  %3488 = vmatprep.subr.msk.bf16.mxu1 %vm4581_vm11, %v3486_v32  ;;  %v3737_v57 = vpop.eup %3736  ;;  %v962_v36 = vmul.f32 0.17677669, %v4410_v35  ;;  %v919_v22 = vmul.f32 %v3735_v55, %v4419_v40 }
 0x159   : > { %3476 = vmatprep.subr.msk.bf16.mxu0 %vm4581_vm11, %v3474_v31  ;;  %v3739_v58 = vpop.eup %3738  ;;  %v917_v16 = vmul.f32 %v3737_v57, %v4422_v41  ;;  %v1678_v41 = vpop.permute.xlu1 %1677 }
 0x15a   : > { %v3741_v59 = vpop.eup %3740  ;;  %v923_v35 = vmul.f32 %v3739_v58, %v4431_v46  ;;  %v1672_v46 = vpop.permute.xlu0 %1671  ;;  %vm1752_vm10 = vcmp.eq.s32.totalorder %v1678_v41, %v3114_v3 }
 0x15b   : > { %v921_v29 = vmul.f32 %v3741_v59, %v4434_v47  ;;  %v3498_v60 = vpack.c.bf16 %v919_v22, %v917_v16 }
 0x15d   : > { %v3510_v26 = vpack.c.bf16 %v923_v35, %v921_v29  ;;  %v1675_v47 = vpop.permute.xlu1 %1674 }
 0x15e   : > { %3292 = vmatmul.mubr.msk.f32.vlgmr.msra.gmra.mrb[2].mxu1 %vm715_vm0, %v959_v54  ;;  %vm1751_vm8 = vcmp.eq.s32.totalorder %v1675_v47, %v3113_v9  ;;  %v1702_v23 = vpop.permute.xlu0 %1701 }
 0x15f   : > { %3281 = vmatmul.mubr.msk.f32.vlgmr.msra.gmra.mrb[2].mxu0 %vm715_vm0, %v957_v50  ;;  %3491 = vmatpush3.bf16.xpose.msk.msra.mxu1 %vm4581_vm11, %v3486_v32  ;;  %vm1760_vm4 = vcmp.eq.s32.totalorder %v1702_v23, %v3118_v5 }
 0x160   : > { %3479 = vmatpush3.bf16.xpose.msk.msra.mxu0 %vm4581_vm11, %v3474_v31  ;;  %3494 = vmatprep.subr.msk.bf16.mxu1 %vm4581_vm11, %v3474_v31 }
 0x161   : > { %3482 = vmatprep.subr.msk.bf16.mxu0 %vm4581_vm11, %v4656_v6  ;;  %3302 = vmatprep.mubr.msk.f32.mxu0 %vm715_vm0, %v960_v56  ;;  %v1681_v52 = vpop.permute.xlu1 %1680 }
 0x162   : > { %3313 = vmatprep.mubr.msk.f32.mxu1 %vm715_vm0, %v962_v36  ;;  %vm1753_vm9 = vcmp.eq.s32.totalorder %v1681_v52, %v3114_v3  ;;  %v1705_v49 = vpop.permute.xlu0 %1704 }
 0x163   : > { %vm1761_vm2 = vcmp.eq.s32.totalorder %v1705_v49, %v3118_v5 }
 0x165   : > { %v1684_v40 = vpop.permute.xlu1 %1683 }
 0x166   : > { %vm1754_vm14 = vcmp.eq.s32.totalorder %v1684_v40, %v3115_v19  ;;  %v1714_v35 = vpop.permute.xlu0 %1713 }
 0x167   : > { %3497 = vmatpush3.bf16.xpose.msk.msra.mxu1 %vm4581_vm11, %v3474_v31 }
 0x168   : > { %3485 = vmatpush3.bf16.xpose.msk.msra.mxu0 %vm4581_vm11, %v4656_v6  ;;  %3512 = vmatprep.subr.msk.bf16.mxu1 %vm4581_vm11, %v3510_v26 }
 0x169   : > { %3500 = vmatprep.subr.msk.bf16.mxu0 %vm4581_vm11, %v3498_v60  ;;  %v1690_v6 = vpop.permute.xlu1 %1689 }
 0x16a   : > { %vm1756_vm15 = vcmp.eq.s32.totalorder %v1690_v6, %v3116_v30 }
 0x16d   : > { %v1687_v25 = vpop.permute.xlu1 %1686 }
 0x16e   : > { %3314 = vmatmul.mubr.msk.f32.vlgmr.msra.gmra.mrb[4].mxu1 %vm715_vm0, %v963_v62  ;;  %vm1755_vm12 = vcmp.eq.s32.totalorder %v1687_v25, %v3115_v19  ;;  %v1717_v62 = vpop.permute.xlu0 %1716 }
 0x16f   : > { %3303 = vmatmul.mubr.msk.f32.vlgmr.msra.gmra.mrb[4].mxu0 %vm715_vm0, %v961_v61  ;;  %3515 = vmatpush3.bf16.xpose.msk.msra.mxu1 %vm4581_vm11, %v3510_v26  ;;  %v3120_v61 = vld [vmem:[%s4760_s17 + $0x7] ss:$0 sm:$0xff] }
 0x170   : > { %3503 = vmatpush3.bf16.xpose.msk.msra.mxu0 %vm4581_vm11, %v3498_v60  ;;  %3518 = vmatprep.subr.msk.bf16.mxu1 %vm4581_vm11, %v3498_v60  ;;  %vm1764_vm6 = vcmp.eq.s32.totalorder %v1714_v35, %v3120_v61 }
 0x171   : > { %3506 = vmatprep.subr.msk.bf16.mxu0 %vm4581_vm11, %v3486_v32  ;;  %3324 = vmatprep.mubr.msk.f32.mxu0 %vm715_vm0, %v964_v33  ;;  %v1693_v0 = vpop.permute.xlu1 %1692 }
 0x172   : > { %3335 = vmatprep.mubr.msk.f32.mxu1 %vm715_vm0, %v966_v63  ;;  %vm1757_vm13 = vcmp.eq.s32.totalorder %v1693_v0, %v3116_v30 }
 0x175   : > { %v1696_v17 = vpop.permute.xlu1 %1695 }
 0x176   : > { %vm1758_vm3 = vcmp.eq.s32.totalorder %v1696_v17, %v3117_v45 }
 0x177   : > { %3521 = vmatpush3.bf16.xpose.msk.msra.mxu1 %vm4581_vm11, %v3498_v60  ;;  %v3119_v60 = vld [vmem:[%s4760_s17 + $0x6] ss:$0 sm:$0xff] }
 0x178   : > { %3509 = vmatpush3.bf16.xpose.msk.msra.mxu0 %vm4581_vm11, %v3486_v32  ;;  %vm1750_vm11 = vcmp.eq.s32.totalorder %v1672_v46, %v3113_v9 }
 0x179   : > { %v1699_v48 = vpop.permute.xlu1 %1698 }
 0x17a   : > { %vm1759_vm1 = vcmp.eq.s32.totalorder %v1699_v48, %v3117_v45 }
 0x17d   : > { %v1708_v29 = vpop.permute.xlu1 %1707 }
 0x17e   : > { %3336 = vmatmul.mubr.msk.f32.vlgmr.msra.gmra.mrb[6].mxu1 %vm715_vm0, %v967_v34  ;;  %vm1762_vm5 = vcmp.eq.s32.totalorder %v1708_v29, %v3119_v60 }
 0x17f   : > { %3325 = vmatmul.mubr.msk.f32.vlgmr.msra.gmra.mrb[6].mxu0 %vm715_vm0, %v965_v28 }
 0x181   : > { %v1711_v26 = vpop.permute.xlu1 %1710 }
 0x182   : > { %vm1763_vm7 = vcmp.eq.s32.totalorder %v1711_v26, %v3119_v60 }
 0x221   : > { %v3271_v10 = vpop.f32.mrb[0].mxu1 }
 0x222   : > { %v3260_v8 = vpop.f32.mrb[0].mxu0  ;;  %v4766_v12 = vsel %vm1753_vm9, -50000.0, %v3271_v10  ;;  %v1139_v13 = vpop.f32.mrb[1].mxu1  ;;  %vm2697_vm9 = vcmask 130112  }
 0x223   : > { %v4764_v7 = vsel %vm1751_vm8, -50000.0, %v3260_v8  ;;  %v1052_v11 = vpop.f32.mrb[1].mxu0  ;;  %v4770_v15 = vsel %vm1752_vm10, -50000.0, %v1139_v13  ;;  %v1791_v18 = vsel %vm715_vm0, %v4766_v12, -inf  ;;  %vm1765_vm8 = vcmp.eq.s32.totalorder %v1717_v62, %v3120_v61 }
 0x224   : > { %v1785_v14 = vsel %vm715_vm0, %v4764_v7, -inf  ;;  %v4774_v21 = vsel %vm1750_vm11, -50000.0, %v1052_v11  ;;  %1792 = vmax.xlane.f32.xlu1 %v1791_v18  ;;  %v1788_v24 = vsel %vm715_vm0, %v4770_v15, -inf  ;;  %vm2762_vm10 = vcmask 1041409  }
 0x225   : > { %1786 = vmax.xlane.f32.xlu0 %v1785_v14  ;;  %v1782_v1 = vsel %vm715_vm0, %v4774_v21, -inf  ;;  %vm2764_vm11 = vcmask 1042434  }
 0x228   : > { %1783 = vmax.xlane.f32.xlu1 %v1782_v1 }
 0x229   : > { %1789 = vmax.xlane.f32.xlu0 %v1788_v24 }
 0x231   : > { %v3293_v2 = vpop.f32.mrb[2].mxu1 }
 0x232   : > { %v3282_v53 = vpop.f32.mrb[2].mxu0  ;;  %v4784_v38 = vsel %vm1757_vm13, -50000.0, %v3293_v2  ;;  %v1313_v51 = vpop.f32.mrb[3].mxu1  ;;  %vm2768_vm13 = vcmask 1044484  }
 0x233   : > { %v4782_v20 = vsel %vm1755_vm12, -50000.0, %v3282_v53  ;;  %v1226_v37 = vpop.f32.mrb[3].mxu0  ;;  %v1803_v4 = vsel %vm715_vm0, %v4784_v38, -inf  ;;  %v4792_v43 = vsel %vm1756_vm15, -50000.0, %v1313_v51  ;;  %vm2766_vm12 = vcmask 1043459  }
 0x234   : > { %v1797_v39 = vsel %vm715_vm0, %v4782_v20, -inf  ;;  %v4788_v42 = vsel %vm1754_vm14, -50000.0, %v1226_v37  ;;  %1804 = vmax.xlane.f32.xlu1 %v1803_v4  ;;  %v1800_v27 = vsel %vm715_vm0, %v4792_v43, -inf  ;;  %vm2770_vm14 = vcmask 1045509  }
 0x235   : > { %1798 = vmax.xlane.f32.xlu0 %v1797_v39  ;;  %v1794_v44 = vsel %vm715_vm0, %v4788_v42, -inf  ;;  %vm2772_vm15 = vcmask 1046534  }
 0x238   : > { %1801 = vmax.xlane.f32.xlu1 %v1800_v27 }
 0x239   : > { %1795 = vmax.xlane.f32.xlu0 %v1794_v44 }
 0x241   : > { %v3315_v50 = vpop.f32.mrb[4].mxu1 }
 0x242   : > { %v3304_v31 = vpop.f32.mrb[4].mxu0  ;;  %v4802_v55 = vsel %vm1761_vm2, -50000.0, %v3315_v50  ;;  %v1487_v56 = vpop.f32.mrb[5].mxu1  ;;  %vm2777_vm2 = vcmask 130048  }
 0x243   : > { %v4800_v32 = vsel %vm1759_vm1, -50000.0, %v3304_v31  ;;  %v1400_v54 = vpop.f32.mrb[5].mxu0  ;;  %v1815_v58 = vsel %vm715_vm0, %v4802_v55, -inf  ;;  %v4810_v59 = vsel %vm1760_vm4, -50000.0, %v1487_v56  ;;  %vm2774_vm1 = vcmask 1047559  }
 0x244   : > { %v1809_v57 = vsel %vm715_vm0, %v4800_v32, -inf  ;;  %v4806_v36 = vsel %vm1758_vm3, -50000.0, %v1400_v54  ;;  %1816 = vmax.xlane.f32.xlu1 %v1815_v58  ;;  %v1812_v22 = vsel %vm715_vm0, %v4810_v59, -inf }
 0x245   : > { %1810 = vmax.xlane.f32.xlu0 %v1809_v57  ;;  %v1806_v16 = vsel %vm715_vm0, %v4806_v36, -inf }
 0x248   : > { %1813 = vmax.xlane.f32.xlu1 %v1812_v22 }
 0x249   : > { %1807 = vmax.xlane.f32.xlu0 %v1806_v16 }
 0x251   : > { %v3337_v63 = vpop.f32.mrb[6].mxu1 }
 0x252   : > { %v3326_v33 = vpop.f32.mrb[6].mxu0  ;;  %v1661_v41 = vpop.f32.mrb[7].mxu1  ;;  %v4828_v40 = vsel %vm1765_vm8, -50000.0, %v3337_v63 }
 0x253   : > { %v1574_v28 = vpop.f32.mrb[7].mxu0  ;;  %v4820_v47 = vsel %vm1764_vm6, -50000.0, %v1661_v41  ;;  %v4824_v9 = vsel %vm1763_vm7, -50000.0, %v3326_v33  ;;  %v1827_v8 = vsel %vm715_vm0, %v4828_v40, -inf  ;;  %v658_v41 = vld [vmem:[%s4320_s28 + $0x8] sm:$0xff] }
 0x254   : > { %v4818_v34 = vsel %vm1762_vm5, -50000.0, %v1574_v28  ;;  %v1824_v3 = vsel %vm715_vm0, %v4820_v47, -inf  ;;  %v1821_v46 = vsel %vm715_vm0, %v4824_v9, -inf  ;;  %v657_v28 = vld [vmem:[%s4320_s28] sm:$0xff] }
 0x255   : > { %v1818_v52 = vsel %vm715_vm0, %v4818_v34, -inf  ;;  %1825 = vmax.xlane.f32.xlu1 %v1824_v3  ;;  %v3522_v3 = vpack.c.bf16 %v658_v41, %v657_v28 }
 0x256   : > { %1819 = vmax.xlane.f32.xlu0 %v1818_v52  ;;  %v659_v52 = vld [vmem:[%s4320_s28 + $0x10] sm:$0xff] }
 0x257   : > { %3523 = vmatprep.subr.bf16.mxu0 %v3522_v3 }
 0x258   : > { %3525 = vmatpush3.bf16.msra.mxu0 %v3522_v3 }
 0x259   : > { %1828 = vmax.xlane.f32.xlu1 %v1827_v8 }
 0x25a   : > { %1822 = vmax.xlane.f32.xlu0 %v1821_v46  ;;  %v660_v46 = vld [vmem:[%s4320_s28 + $0x18] sm:$0xff] }
 0x2b1   : > { %v4836_v11 = vpop.xlane.xlu1 %1792 }
 0x2b2   : > { %v4834_v10 = vpop.xlane.xlu0 %1786  ;;  %v1833_v14 = vsub.f32 %v4766_v12, %v4836_v11 }
 0x2b3   : > { %v1831_v13 = vsub.f32 %v4764_v7, %v4834_v10 }
 0x2b4   : > { %v1852_v6 = vmul.f32 1.442695, %v1833_v14 }
 0x2b5   : > { %v1848_v18 = vmul.f32 1.442695, %v1831_v13  ;;  %v4844_v1 = vpop.xlane.xlu1 %1783  ;;  %v674_v13 = vld [vmem:[%s504_s12 + $0x8] sm:$0xff] }
 0x2b6   : > { %v4842_v24 = vpop.xlane.xlu0 %1789  ;;  %v1830_v19 = vsub.f32 %v4774_v21, %v4844_v1 }
 0x2b7   : > { %3742 = vpow2.f32 %v1848_v18  ;;  %v1832_v25 = vsub.f32 %v4770_v15, %v4842_v24 }
 0x2b8   : > { %3744 = vpow2.f32 %v1852_v6  ;;  %v1846_v0 = vmul.f32 1.442695, %v1830_v19 }
 0x2b9   : > { %v1850_v30 = vmul.f32 1.442695, %v1832_v25 }
 0x2bb   : > { %3746 = vpow2.f32 %v1850_v30 }
 0x2bc   : > { %3748 = vpow2.f32 %v1846_v0 }
 0x2c1   : > { %v4850_v7 = vpop.eup %3742  ;;  %v4858_v37 = vpop.xlane.xlu1 %1804 }
 0x2c2   : > { %v4852_v12 = vpop.eup %3744  ;;  %v4854_v53 = vpop.xlane.xlu0 %1798  ;;  %v1881_v2 = vsel %vm715_vm0, %v4850_v7, 0.0  ;;  %v1837_v51 = vsub.f32 %v4784_v38, %v4858_v37 }
 0x2c3   : > { %v1835_v15 = vsub.f32 %v4782_v20, %v4854_v53  ;;  %v1887_v21 = vsel %vm715_vm0, %v4852_v12, 0.0  ;;  %1882 = vadd.xlane.f32.xlu0 %v1881_v2 }
 0x2c4   : > { %1888 = vadd.xlane.f32.xlu1 %v1887_v21  ;;  %v1860_v27 = vmul.f32 1.442695, %v1837_v51 }
 0x2c5   : > { %v4866_v39 = vpop.eup %3746  ;;  %v1856_v4 = vmul.f32 1.442695, %v1835_v15  ;;  %v4874_v20 = vpop.xlane.xlu1 %1801 }
 0x2c6   : > { %v4868_v44 = vpop.eup %3748  ;;  %v4870_v17 = vpop.xlane.xlu0 %1795  ;;  %v1884_v23 = vsel %vm715_vm0, %v4866_v39, 0.0  ;;  %v1836_v5 = vsub.f32 %v4792_v43, %v4874_v20 }
 0x2c7   : > { %3750 = vpow2.f32 %v1856_v4  ;;  %v1834_v45 = vsub.f32 %v4788_v42, %v4870_v17  ;;  %v1878_v38 = vsel %vm715_vm0, %v4868_v44, 0.0 }
 0x2c8   : > { %3752 = vpow2.f32 %v1860_v27  ;;  %1879 = vadd.xlane.f32.xlu0 %v1878_v38  ;;  %1885 = vadd.xlane.f32.xlu1 %v1884_v23  ;;  %v1858_v49 = vmul.f32 1.442695, %v1836_v5 }
 0x2c9   : > { %v1854_v48 = vmul.f32 1.442695, %v1834_v45 }
 0x2cb   : > { %3754 = vpow2.f32 %v1854_v48 }
 0x2cc   : > { %3756 = vpow2.f32 %v1858_v49  ;;  %v661_v49 = vld [vmem:[%s4320_s28 + $0x20] sm:$0xff] }
 0x2d1   : > { %v4882_v31 = vpop.eup %3750  ;;  %v4890_v56 = vpop.xlane.xlu1 %1816 }
 0x2d2   : > { %v4884_v50 = vpop.eup %3752  ;;  %v4886_v54 = vpop.xlane.xlu0 %1810  ;;  %v1893_v42 = vsel %vm715_vm0, %v4882_v31, 0.0  ;;  %v1841_v58 = vsub.f32 %v4802_v55, %v4890_v56 }
 0x2d3   : > { %v1839_v43 = vsub.f32 %v4800_v32, %v4886_v54  ;;  %v1899_v57 = vsel %vm715_vm0, %v4884_v50, 0.0  ;;  %1894 = vadd.xlane.f32.xlu0 %v1893_v42  ;;  %v662_v42 = vld [vmem:[%s4320_s28 + $0x28] sm:$0xff] }
 0x2d4   : > { %1900 = vadd.xlane.f32.xlu1 %v1899_v57  ;;  %v1868_v35 = vmul.f32 1.442695, %v1841_v58  ;;  %v3538_v57 = vpack.c.bf16 %v662_v42, %v661_v49  ;;  %v664_v58 = vld [vmem:[%s4320_s28 + $0x38] sm:$0xff] }
 0x2d5   : > { %v4898_v16 = vpop.eup %3754  ;;  %v1864_v22 = vmul.f32 1.442695, %v1839_v43  ;;  %v4906_v26 = vpop.xlane.xlu1 %1813  ;;  %v663_v43 = vld [vmem:[%s4320_s28 + $0x30] sm:$0xff] }
 0x2d6   : > { %v4900_v29 = vpop.eup %3756  ;;  %v4902_v60 = vpop.xlane.xlu0 %1807  ;;  %v1890_v32 = vsel %vm715_vm0, %v4898_v16, 0.0  ;;  %v1840_v62 = vsub.f32 %v4810_v59, %v4906_v26  ;;  %v673_v59 = vld [vmem:[%s504_s12] sm:$0xff] }
 0x2d7   : > { %3758 = vpow2.f32 %v1864_v22  ;;  %v1838_v55 = vsub.f32 %v4806_v36, %v4902_v60  ;;  %v1896_v61 = vsel %vm715_vm0, %v4900_v29, 0.0  ;;  %1891 = vadd.xlane.f32.xlu0 %v1890_v32  ;;  %v4918_v36 = vpack.c.bf16 %v660_v46, %v659_v52 }
 0x2d8   : > { %3760 = vpow2.f32 %v1868_v35  ;;  %1897 = vadd.xlane.f32.xlu1 %v1896_v61  ;;  %v1866_v63 = vmul.f32 1.442695, %v1840_v62  ;;  %v3526_v6 = vpack.c.bf16 %v674_v13, %v673_v59  ;;  %v4960_v22 = vpack.c.bf16 %v664_v58, %v663_v43 }
 0x2d9   : > { %v1862_v33 = vmul.f32 1.442695, %v1838_v55  ;;  %3531 = vmatprep.subr.bf16.mxu1 %v4918_v36 }
 0x2da   : > { %3533 = vmatpush3.bf16.msra.mxu1 %v4918_v36  ;;  %3527 = vmatprep.subr.bf16.mxu0 %v3526_v6 }
 0x2db   : > { %3762 = vpow2.f32 %v1862_v33  ;;  %3535 = vmatprep.subr.bf16.mxu1 %v3522_v3  ;;  %3529 = vmatpush3.bf16.msra.mxu0 %v3526_v6 }
 0x2dc   : > { %3764 = vpow2.f32 %v1866_v63  ;;  %3539 = vmatprep.subr.bf16.mxu0 %v3538_v57 }
 0x2de   : > { %3537 = vmatpush3.bf16.msra.mxu1 %v3522_v3 }
 0x2df   : > { %3547 = vmatprep.subr.bf16.mxu1 %v4960_v22 }
 0x2e1   : > { %v4920_v8 = vpop.eup %3758 }
 0x2e2   : > { %v4925_v14 = vpop.eup %3760  ;;  %v1905_v18 = vsel %vm715_vm0, %v4920_v8, 0.0  ;;  %v4934_v30 = vpop.xlane.xlu1 %1825 }
 0x2e3   : > { %v1911_v25 = vsel %vm715_vm0, %v4925_v14, 0.0  ;;  %1906 = vadd.xlane.f32.xlu0 %v1905_v18  ;;  %v4932_v19 = vpop.xlane.xlu0 %1819  ;;  %v1844_v15 = vsub.f32 %v4820_v47, %v4934_v30 }
 0x2e4   : > { %1912 = vadd.xlane.f32.xlu1 %v1911_v25  ;;  %v1842_v0 = vsub.f32 %v4818_v34, %v4932_v19 }
 0x2e5   : > { %v4938_v2 = vpop.eup %3762  ;;  %v1874_v27 = vmul.f32 1.442695, %v1844_v15 }
 0x2e6   : > { %v4942_v21 = vpop.eup %3764  ;;  %v1870_v51 = vmul.f32 1.442695, %v1842_v0  ;;  %v1902_v4 = vsel %vm715_vm0, %v4938_v2, 0.0  ;;  %v4950_v47 = vpop.xlane.xlu1 %1828 }
 0x2e7   : > { %v1908_v34 = vsel %vm715_vm0, %v4942_v21, 0.0  ;;  %1903 = vadd.xlane.f32.xlu0 %v1902_v4  ;;  %v4948_v23 = vpop.xlane.xlu0 %1822  ;;  %v1845_v38 = vsub.f32 %v4828_v40, %v4950_v47  ;;  %v668_v4 = vld [vmem:[%s4320_s28 + $0x58] sm:$0xff] }
 0x2e8   : > { %3766 = vpow2.f32 %v1870_v51  ;;  %1909 = vadd.xlane.f32.xlu1 %v1908_v34  ;;  %v1843_v45 = vsub.f32 %v4824_v9, %v4948_v23  ;;  %v667_v51 = vld [vmem:[%s4320_s28 + $0x50] sm:$0xff] }
 0x2e9   : > { %3768 = vpow2.f32 %v1874_v27  ;;  %v1876_v48 = vmul.f32 1.442695, %v1845_v38 }
 0x2ea   : > { %v1872_v5 = vmul.f32 1.442695, %v1843_v45 }
 0x2ec   : > { %3770 = vpow2.f32 %v1872_v5 }
 0x2ed   : > { %3772 = vpow2.f32 %v1876_v48 }
 0x2f2   : > { %v4963_v35 = vpop.eup %3766 }
 0x2f3   : > { %v4965_v9 = vpop.eup %3768  ;;  %v1914_v40 = vsel %vm715_vm0, %v4963_v35, 0.0 }
 0x2f4   : > { %v1920_v32 = vsel %vm715_vm0, %v4965_v9, 0.0  ;;  %1915 = vadd.xlane.f32.xlu0 %v1914_v40 }
 0x2f5   : > { %1921 = vadd.xlane.f32.xlu1 %v1920_v32 }
 0x2f6   : > { %v4971_v55 = vpop.eup %3770 }
 0x2f7   : > { %v4973_v61 = vpop.eup %3772  ;;  %v1917_v62 = vsel %vm715_vm0, %v4971_v55, 0.0 }
 0x2f8   : > { %v1923_v33 = vsel %vm715_vm0, %v4973_v61, 0.0  ;;  %1918 = vadd.xlane.f32.xlu0 %v1917_v62  ;;  %v671_v62 = vld [vmem:[%s4320_s28 + $0x70] sm:$0xff] }
 0x2f9   : > { %1924 = vadd.xlane.f32.xlu1 %v1923_v33  ;;  %v672_v33 = vld [vmem:[%s4320_s28 + $0x78] sm:$0xff] }
 0x350   : > { %v1883_v63 = vpop.xlane.xlu0 %1882 }
 0x351   : > { %v1889_v28 = vpop.xlane.xlu1 %1888 }
 0x352   : > { %3774 = vrcp.f32 %v1889_v28 }
 0x355   : > { %v1886_v41 = vpop.xlane.xlu1 %1885  ;;  %v1880_v52 = vpop.xlane.xlu0 %1879 }
 0x356   : > { %3776 = vrcp.f32 %v1886_v41 }
 0x357   : > { %3778 = vrcp.f32 %v1883_v63 }
 0x358   : > { %3780 = vrcp.f32 %v1880_v52 }
 0x35c   : > { %v3775_v3 = vpop.eup %3774 }
 0x35d   : > { %v1993_v0 = vmul.f32 %v3775_v3, %v4852_v12  ;;  %v665_v12 = vld [vmem:[%s4320_s28 + $0x40] sm:$0xff]  ;;  %v2686_v3 = vlaneseq }
 0x360   : > { %v1895_v46 = vpop.xlane.xlu0 %1894  ;;  %v3777_v59 = vpop.eup %3776 }
 0x361   : > { %v4979_v13 = vpop.xlane.xlu1 %1900  ;;  %v3779_v18 = vpop.eup %3778  ;;  %v1992_v6 = vmul.f32 %v3777_v59, %v4866_v39  ;;  %v666_v39 = vld [vmem:[%s4320_s28 + $0x48] sm:$0xff] }
 0x362   : > { %v3781_v25 = vpop.eup %3780  ;;  %3782 = vrcp.f32 %v4979_v13  ;;  %v1991_v27 = vmul.f32 %v3779_v18, %v4850_v7  ;;  %v3554_v7 = vpack.c.bf16 %v666_v39, %v665_v12 }
 0x363   : > { %v1990_v15 = vmul.f32 %v3781_v25, %v4868_v44  ;;  %3357 = vmatprep.mubr.msk.f32.mxu1 %vm715_vm0, %v1992_v6  ;;  %3784 = vrcp.f32 %v1895_v46  ;;  %v4995_v44 = vpack.c.bf16 %v668_v4, %v667_v51  ;;  %v2687_v25 = vand.u32 127, %v2686_v3 }
 0x364   : > { %3358 = vmatmul.mubr.msk.f32.vlgmr.msra.gmra.mrb[8].mxu1 %vm715_vm0, %v1993_v0  ;;  %v1892_v45 = vpop.xlane.xlu0 %1891  ;;  %v2689_v4 = vshrl.u32 %v2686_v3, 7 }
 0x365   : > { %v1898_v34 = vpop.xlane.xlu1 %1897  ;;  %3346 = vmatprep.mubr.msk.f32.mxu0 %vm715_vm0, %v1990_v15  ;;  %3549 = vmatpush3.bf16.msra.mxu1 %v4960_v22 }
 0x366   : > { %3347 = vmatmul.mubr.msk.f32.vlgmr.msra.gmra.mrb[8].mxu0 %vm715_vm0, %v1991_v27  ;;  %3786 = vrcp.f32 %v1898_v34  ;;  %3551 = vmatprep.subr.bf16.mxu1 %v3538_v57  ;;  %v5019_v39 = vsub.s32 %v2687_v25, %v2689_v4 }
 0x367   : > { %3788 = vrcp.f32 %v1892_v45  ;;  %3541 = vmatpush3.bf16.msra.mxu0 %v3538_v57 }
 0x368   : > { %3543 = vmatprep.subr.bf16.mxu0 %v4918_v36  ;;  %3790 = vlog2.f32 %v1883_v63 }
 0x369   : > { %3553 = vmatpush3.bf16.msra.mxu1 %v3538_v57  ;;  %3792 = vlog2.f32 %v1889_v28  ;;  %v670_v28 = vld [vmem:[%s4320_s28 + $0x68] sm:$0xff] }
 0x36a   : > { %3563 = vmatprep.subr.bf16.mxu1 %v4995_v44  ;;  %3794 = vlog2.f32 %v1886_v41 }
 0x36b   : > { %3545 = vmatpush3.bf16.msra.mxu0 %v4918_v36  ;;  %3796 = vlog2.f32 %v1880_v52 }
 0x36c   : > { %3555 = vmatprep.subr.bf16.mxu0 %v3554_v7  ;;  %v3783_v38 = vpop.eup %3782  ;;  %3798 = vlog2.f32 %v1895_v46 }
 0x36d   : > { %v3785_v5 = vpop.eup %3784  ;;  %3800 = vlog2.f32 %v1892_v45  ;;  %v1997_v58 = vmul.f32 %v3783_v38, %v4884_v50  ;;  %v2692_v45 = vadd.s32 4294967288, %v2687_v25 }
 0x36e   : > { %3802 = vlog2.f32 %v1898_v34  ;;  %v1995_v40 = vmul.f32 %v3785_v5, %v4882_v31  ;;  %v3578_v31 = vpack.c.bf16 %v672_v33, %v671_v62 }
 0x370   : > { %v1907_v48 = vpop.xlane.xlu0 %1906  ;;  %v3787_v49 = vpop.eup %3786 }
 0x371   : > { %v1913_v42 = vpop.xlane.xlu1 %1912  ;;  %v3789_v43 = vpop.eup %3788  ;;  %v1996_v57 = vmul.f32 %v3787_v49, %v4900_v29  ;;  %v669_v29 = vld [vmem:[%s4320_s28 + $0x60] sm:$0xff]  ;;  %s5092_s28 = scalar_lea.hbm %s5211_s7, %s3141_s20 }
 0x372   : > { %v1994_v36 = vmul.f32 %v3789_v43, %v4898_v16  ;;  %3804 = vrcp.f32 %v1913_v42  ;;  %v3791_v50 = vpop.eup %3790  ;;  %v5014_v41 = vpack.c.bf16 %v670_v28, %v669_v29 }
 0x373   : > { %3379 = vmatprep.mubr.msk.f32.mxu1 %vm715_vm0, %v1996_v57  ;;  %3806 = vrcp.f32 %v1907_v48  ;;  %v3793_v16 = vpop.eup %3792  ;;  %v1929_v12 = vmul.f32 0.6931472, %v3791_v50 }
 0x374   : > { %v1904_v32 = vpop.xlane.xlu0 %1903  ;;  %3368 = vmatprep.mubr.msk.f32.mxu0 %vm715_vm0, %v1994_v36  ;;  %3380 = vmatmul.mubr.msk.f32.vlgmr.msra.gmra.mrb[10].mxu1 %vm715_vm0, %v1997_v58  ;;  %v3795_v52 = vpop.eup %3794  ;;  %v1933_v5 = vmul.f32 0.6931472, %v3793_v16 }
 0x375   : > { %v1910_v63 = vpop.xlane.xlu1 %1909  ;;  %3369 = vmatmul.mubr.msk.f32.vlgmr.msra.gmra.mrb[10].mxu0 %vm715_vm0, %v1995_v40  ;;  %3808 = vlog2.f32 %v1904_v32  ;;  %3565 = vmatpush3.bf16.msra.mxu1 %v4995_v44  ;;  %v3797_v46 = vpop.eup %3796  ;;  %v1931_v15 = vmul.f32 0.6931472, %v3795_v52 }
 0x376   : > { %3810 = vrcp.f32 %v1910_v63  ;;  %3557 = vmatpush3.bf16.msra.mxu0 %v3554_v7  ;;  %3567 = vmatprep.subr.bf16.mxu1 %v3554_v7  ;;  %v3799_v59 = vpop.eup %3798 }
 0x377   : > { %3812 = vrcp.f32 %v1904_v32  ;;  %3559 = vmatprep.subr.bf16.mxu0 %v4960_v22  ;;  %v3801_v18 = vpop.eup %3800  ;;  %v1937_v57 = vmul.f32 0.6931472, %v3799_v59 }
 0x378   : > { %3814 = vlog2.f32 %v4979_v13  ;;  %v3803_v6 = vpop.eup %3802  ;;  %v1927_v13 = vmul.f32 0.6931472, %v3797_v46 }
 0x379   : > { %3816 = vlog2.f32 %v1907_v48  ;;  %3569 = vmatpush3.bf16.msra.mxu1 %v3554_v7  ;;  %v1935_v7 = vmul.f32 0.6931472, %v3801_v18  ;;  %v1960_v48 = vadd.f32 %v1931_v15, %v4842_v24  ;;  %v1939_v62 = vmul.f32 0.6931472, %v3803_v6 }
 0x37a   : > { %3818 = vlog2.f32 %v1910_v63  ;;  %3561 = vmatpush3.bf16.msra.mxu0 %v4960_v22  ;;  %3579 = vmatprep.subr.bf16.mxu1 %v3578_v31  ;;  %v1958_v32 = vadd.f32 %v1927_v13, %v4844_v1  ;;  %v5028_v63 = vsub.s32 %v2692_v45, %v2689_v4  ;;  %v1961_v1 = vadd.f32 %v1933_v5, %v4836_v11 }
 0x37b   : > { %3571 = vmatprep.subr.bf16.mxu0 %v5014_v41  ;;  %3820 = vlog2.f32 %v1913_v42  ;;  %v1963_v16 = vadd.f32 %v1937_v57, %v4854_v53 }
 0x37c   : > { %v3805_v0 = vpop.eup %3804  ;;  %v2691_v11 = vrot.slane %v1958_v32, %v5019_v39  ;;  %v2706_v53 = vrot.slane %v1961_v1, %v5028_v63 }
 0x37d   : > { %v3807_v51 = vpop.eup %3806  ;;  %v2001_v58 = vmul.f32 %v3805_v0, %v4925_v14 }
 0x37e   : > { %v1999_v24 = vmul.f32 %v3807_v51, %v4920_v8 }
 0x37f   : > { %v3809_v27 = vpop.eup %3808 }
 0x380   : > { %v3811_v34 = vpop.eup %3810  ;;  %v1943_v29 = vmul.f32 0.6931472, %v3809_v27 }
 0x381   : > { %v1916_v22 = vpop.xlane.xlu0 %1915  ;;  %v3813_v38 = vpop.eup %3812  ;;  %v2000_v42 = vmul.f32 %v3811_v34, %v4942_v21  ;;  %v1962_v21 = vadd.f32 %v1935_v7, %v4870_v17  ;;  %v2702_v17 = vrot.slane %v1960_v48, %v5019_v39 }
 0x382   : > { %v1922_v49 = vpop.xlane.xlu1 %1921  ;;  %3822 = vlog2.f32 %v1916_v22  ;;  %v3815_v43 = vpop.eup %3814  ;;  %v1998_v36 = vmul.f32 %v3813_v38, %v4938_v2  ;;  %v1959_v2 = vadd.f32 %v1929_v12, %v4834_v10  ;;  %v1964_v10 = vadd.f32 %v1939_v62, %v4874_v20 }
 0x383   : > { %3824 = vlog2.f32 %v1922_v49  ;;  %v3817_v40 = vpop.eup %3816  ;;  %3401 = vmatprep.mubr.msk.f32.mxu1 %vm715_vm0, %v2000_v42  ;;  %v1941_v28 = vmul.f32 0.6931472, %v3815_v43  ;;  %v1966_v46 = vadd.f32 %v1943_v29, %v4902_v60  ;;  %v2715_v20 = vrot.slane %v1963_v16, %v5028_v63 }
 0x384   : > { %3826 = vrcp.f32 %v1922_v49  ;;  %v3819_v33 = vpop.eup %3818  ;;  %3390 = vmatprep.mubr.msk.f32.mxu0 %vm715_vm0, %v1998_v36  ;;  %3402 = vmatmul.mubr.msk.f32.vlgmr.msra.gmra.mrb[12].mxu1 %vm715_vm0, %v2001_v58  ;;  %v1945_v52 = vmul.f32 0.6931472, %v3817_v40  ;;  %v2696_v59 = vrot.slane %v1959_v2, %v5028_v63  ;;  %v2707_v60 = vsel %vm2697_vm9, %v2706_v53, %v2702_v17 }
 0x385   : > { %3828 = vrcp.f32 %v1916_v22  ;;  %v1919_v14 = vpop.xlane.xlu0 %1918  ;;  %3391 = vmatmul.mubr.msk.f32.vlgmr.msra.gmra.mrb[12].mxu0 %vm715_vm0, %v1999_v24  ;;  %3581 = vmatpush3.bf16.msra.mxu1 %v3578_v31  ;;  %v3821_v50 = vpop.eup %3820  ;;  %v1947_v3 = vmul.f32 0.6931472, %v3819_v33  ;;  %v2711_v31 = vrot.slane %v1962_v21, %v5019_v39  ;;  %v1965_v18 = vadd.f32 %v1941_v28, %v4858_v37 }
 0x386   : > { %v1925_v8 = vpop.xlane.xlu1 %1924  ;;  %3830 = vlog2.f32 %v1919_v14  ;;  %3573 = vmatpush3.bf16.msra.mxu0 %v5014_v41  ;;  %3583 = vmatprep.subr.bf16.mxu1 %v5014_v41  ;;  %v1949_v6 = vmul.f32 0.6931472, %v3821_v50  ;;  %v1967_v25 = vadd.f32 %v1945_v52, %v4886_v54  ;;  %v2698_v15 = vsel %vm2697_vm9, %v2696_v59, %v2691_v11 }
 0x387   : > { %3832 = vlog2.f32 %v1925_v8  ;;  %3575 = vmatprep.subr.bf16.mxu0 %v4995_v44  ;;  %v2720_v51 = vrot.slane %v1964_v10, %v5019_v39  ;;  %v1968_v4 = vadd.f32 %v1947_v3, %v4906_v26  ;;  %v2729_v27 = vrot.slane %v1966_v46, %v5019_v39 }
 0x388   : > { %3834 = vrcp.f32 %v1925_v8  ;;  %v2724_v54 = vrot.slane %v1965_v18, %v5028_v63  ;;  %v2763_v7 = vsel %vm2762_vm10, %v2707_v60, %v2698_v15  ;;  %v2733_v22 = vrot.slane %v1967_v25, %v5028_v63 }
 0x389   : > { %3836 = vrcp.f32 %v1919_v14  ;;  %3585 = vmatpush3.bf16.msra.mxu1 %v5014_v41  ;;  %v2716_v41 = vsel %vm2697_vm9, %v2715_v20, %v2711_v31  ;;  %v2738_v49 = vrot.slane %v1968_v4, %v5019_v39 }
 0x38a   : > { %3577 = vmatpush3.bf16.msra.mxu0 %v4995_v44  ;;  %v1969_v44 = vadd.f32 %v1949_v6, %v4890_v56  ;;  %v2725_v5 = vsel %vm2697_vm9, %v2724_v54, %v2720_v51  ;;  %v2765_v48 = vsel %vm2764_vm11, %v2716_v41, %v2763_v7  ;;  %v2734_v56 = vsel %vm2697_vm9, %v2733_v22, %v2729_v27 }
 0x38c   : > { %v3823_v0 = vpop.eup %3822 }
 0x38d   : > { %v3825_v37 = vpop.eup %3824  ;;  %v1951_v13 = vmul.f32 0.6931472, %v3823_v0 }
 0x38e   : > { %v3827_v34 = vpop.eup %3826  ;;  %v1955_v45 = vmul.f32 0.6931472, %v3825_v37 }
 0x38f   : > { %v3829_v12 = vpop.eup %3828  ;;  %v2004_v26 = vmul.f32 %v3827_v34, %v4965_v9  ;;  %v1970_v57 = vadd.f32 %v1951_v13, %v4932_v19  ;;  %v2742_v9 = vrot.slane %v1969_v44, %v5028_v63 }
 0x390   : > { %v3831_v38 = vpop.eup %3830  ;;  %v2002_v42 = vmul.f32 %v3829_v12, %v4963_v35  ;;  %v1972_v40 = vadd.f32 %v1955_v45, %v4934_v30  ;;  %v2767_v35 = vsel %vm2766_vm12, %v2725_v5, %v2765_v48 }
 0x391   : > { %v3833_v43 = vpop.eup %3832  ;;  %v1953_v36 = vmul.f32 0.6931472, %v3831_v38  ;;  %3423 = vmatprep.mubr.msk.f32.mxu1 %vm715_vm0, %v2004_v26  ;;  %v2743_v19 = vsel %vm2697_vm9, %v2742_v9, %v2738_v49  ;;  %v2769_v21 = vsel %vm2768_vm13, %v2734_v56, %v2767_v35  ;;  %v2747_v30 = vrot.slane %v1970_v57, %v5019_v39 }
 0x392   : > { %v3835_v58 = vpop.eup %3834  ;;  %v1957_v32 = vmul.f32 0.6931472, %v3833_v43  ;;  %3412 = vmatprep.mubr.msk.f32.mxu0 %vm715_vm0, %v2002_v42 }
 0x393   : > { %v3837_v62 = vpop.eup %3836  ;;  %v2005_v24 = vmul.f32 %v3835_v58, %v4973_v61  ;;  %v1971_v33 = vadd.f32 %v1953_v36, %v4948_v23  ;;  %v2756_v23 = vrot.slane %v1972_v40, %v5019_v39 }
 0x394   : > { %v1973_v29 = vadd.f32 %v1957_v32, %v4950_v47  ;;  %v2003_v14 = vmul.f32 %v3837_v62, %v4971_v55  ;;  %v2771_v55 = vsel %vm2770_vm14, %v2743_v19, %v2769_v21 }
 0x395   : > { %v2751_v1 = vrot.slane %v1971_v33, %v5028_v63  ;;  %3424 = vmatmul.mubr.msk.f32.vlgmr.msra.gmra.mrb[14].mxu1 %vm715_vm0, %v2005_v24 }
 0x396   : > { %v2760_v61 = vrot.slane %v1973_v29, %v5028_v63  ;;  %3413 = vmatmul.mubr.msk.f32.vlgmr.msra.gmra.mrb[14].mxu0 %vm715_vm0, %v2003_v14 }
 0x397   : > { %v2752_v47 = vsel %vm2697_vm9, %v2751_v1, %v2747_v30 }
 0x398   : > { %v2761_v2 = vsel %vm2697_vm9, %v2760_v61, %v2756_v23  ;;  %v2773_v28 = vsel %vm2772_vm15, %v2752_v47, %v2771_v55 }
 0x399   : > { %v2775_v8 = vsel %vm2774_vm1, %v2761_v2, %v2773_v28 }
 0x39a   : > { %2778 = vst.msk [vmem:[%s577_s22] sm:$0xff] %vm2777_vm2, %v2775_v8 }
 0x39b   : > { %3941 = shalt.err (!%p3938_p11)
}
 0x39c   : > { %s3942_s13 = scalar_lea.hbm %s5092_s28, 128  ;;  %s3946_s21 = scalar_lea.hbm %s5211_s7, 256 }
 0x39d   : > { %p3943_p2 = scmp.ne.s32.totalorder %s5092_s28, %s3942_s13  ;;  %p3947_p4 = scmp.lt.u32.totalorder %s5092_s28, %s5211_s7 }
 0x39e   : > { %p3948_p3 = scmp.lt.u32.totalorder %s3946_s21, %s3942_s13  ;;  %p3950_p10 = scmp.lt.u32.totalorder %s3942_s13, %s5092_s28 }
 0x39f   : > { %p3944_p5 = pnand %p3943_p2, %p5255_p8 }
 0x3a0   : > { %p3949_p0 = por %p3948_p3, %p3947_p4 }
 0x3a1   : > { %p3945_p7 = pneg %p3944_p5 }
 0x3a2   : > { %p3951_p9 = por %p3950_p10, %p3949_p0 }
 0x3a4   : > { %p3952_p12 = pnand %p3951_p9, %p3945_p7 }
 0x3a6   : > { %3955 = shalt.err (!%p3952_p12)
}
 0x3a7   : > { %3593 = dma.vmem_to_hbm [thread:$0]  (%p5255_p8), %s2819_s19, 128, %s5092_s28, %s2785_s16  }
 0x3a8   : > { %s5114_s17 = scalar_lea.vmem [#allocation8], %s3056_s11  ;;  %s3151_s11 = sshll.u32 %s4038_s27, 11 }
 0x3a9   : > { %s2801_s12 = sshll.u32 %s5114_s17, 4  ;;  %s5145_s20 = scalar_lea.hbm %s5210_s6, %s3151_s11  ;;  %s5147_s12 = int_to_ptr.vmem [resolvable:$true] %s2801_s12 }
 0x3aa   : > { %s2780_s27 = scalar_lea.sflag [#allocation4], %s4306_s15  ;;  %s3956_s19 = scalar_lea.vmem %s5147_s12, 2048 }
 0x3ab   : > { %p3957_p1 = scmp.ne.s32.totalorder %s5147_s12, %s3956_s19  ;;  %s4055_s29 = smov [#allocation8]  }
 0x3ac   : > { %s3960_s10 = sshll.u32 %s4055_s29, 4  ;;  %s3961_s10 = int_to_ptr.vmem [resolvable:$false] %s3960_s10 }
 0x3ad   : > { %p3958_p6 = pnand %p3957_p1, %p5255_p8  ;;  %s3962_s28 = scalar_lea.vmem %s3961_s10, 4096 }
 0x3ae   : > { %p3963_p11 = scmp.lt.s32.totalorder %s5147_s12, %s3961_s10  ;;  %p3964_p2 = scmp.lt.s32.totalorder %s3962_s28, %s3956_s19 }
 0x3af   : > { %p3959_p13 = pneg %p3958_p6 }
 0x3b0   : > { %p3965_p5 = por %p3964_p2, %p3963_p11 }
 0x3b2   : > { %p3966_p7 = pnand %p3965_p5, %p3959_p13 }
 0x437   : > { %v3359_v39 = vpop.f32.mrb[8].mxu1 }
 0x438   : > { %2657 = vst.msk [vmem:[%s5114_s17 + $0x18] sm:$0xff] %vm715_vm0, %v3359_v39  ;;  %v2159_v63 = vpop.f32.mrb[9].mxu1 }
 0x439   : > { %v3348_v50 = vpop.f32.mrb[8].mxu0  ;;  %2656 = vst.msk [vmem:[%s5114_s17 + $0x10] sm:$0xff] %vm715_vm0, %v2159_v63 }
 0x43a   : > { %2655 = vst.msk [vmem:[%s5114_s17 + $0x8] sm:$0xff] %vm715_vm0, %v3348_v50  ;;  %v2078_v17 = vpop.f32.mrb[9].mxu0 }
 0x43b   : > { %2654 = vst.msk [vmem:[%s5114_s17] sm:$0xff] %vm715_vm0, %v2078_v17 }
 0x447   : > { %v3381_v16 = vpop.f32.mrb[10].mxu1 }
 0x448   : > { %v3370_v52 = vpop.f32.mrb[10].mxu0  ;;  %2661 = vst.msk [vmem:[%s5114_s17 + $0x38] sm:$0xff] %vm715_vm0, %v3381_v16  ;;  %v2321_v11 = vpop.f32.mrb[11].mxu1 }
 0x449   : > { %2659 = vst.msk [vmem:[%s5114_s17 + $0x28] sm:$0xff] %vm715_vm0, %v3370_v52  ;;  %v2240_v10 = vpop.f32.mrb[11].mxu0  ;;  %2660 = vst.msk [vmem:[%s5114_s17 + $0x30] sm:$0xff] %vm715_vm0, %v2321_v11 }
 0x44a   : > { %2658 = vst.msk [vmem:[%s5114_s17 + $0x20] sm:$0xff] %vm715_vm0, %v2240_v10 }
 0x457   : > { %v3403_v3 = vpop.f32.mrb[12].mxu1 }
 0x458   : > { %v3392_v31 = vpop.f32.mrb[12].mxu0  ;;  %2665 = vst.msk [vmem:[%s5114_s17 + $0x58] sm:$0xff] %vm715_vm0, %v3403_v3  ;;  %v2483_v46 = vpop.f32.mrb[13].mxu1 }
 0x459   : > { %2663 = vst.msk [vmem:[%s5114_s17 + $0x48] sm:$0xff] %vm715_vm0, %v3392_v31  ;;  %v2402_v53 = vpop.f32.mrb[13].mxu0  ;;  %2664 = vst.msk [vmem:[%s5114_s17 + $0x50] sm:$0xff] %vm715_vm0, %v2483_v46 }
 0x45a   : > { %2662 = vst.msk [vmem:[%s5114_s17 + $0x40] sm:$0xff] %vm715_vm0, %v2402_v53 }
 0x468   : > { %v3425_v59 = vpop.f32.mrb[14].mxu1 }
 0x469   : > { %v3414_v18 = vpop.f32.mrb[14].mxu0  ;;  %2669 = vst.msk [vmem:[%s5114_s17 + $0x78] sm:$0xff] %vm715_vm0, %v3425_v59  ;;  %v2645_v6 = vpop.f32.mrb[15].mxu1 }
 0x46a   : > { %2667 = vst.msk [vmem:[%s5114_s17 + $0x68] sm:$0xff] %vm715_vm0, %v3414_v18  ;;  %v2564_v20 = vpop.f32.mrb[15].mxu0  ;;  %2668 = vst.msk [vmem:[%s5114_s17 + $0x70] sm:$0xff] %vm715_vm0, %v2645_v6 }
 0x46b   : > { %2666 = vst.msk [vmem:[%s5114_s17 + $0x60] sm:$0xff] %vm715_vm0, %v2564_v20 }
 0x46c   : > { %3969 = shalt.err (!%p3966_p7)
}
 0x46d   : > { %s3970_s16 = scalar_lea.hbm %s5145_s20, 2048  ;;  %s3974_s2 = scalar_lea.hbm %s5210_s6, 4096 }
 0x46e   : > { %p3971_p4 = scmp.ne.s32.totalorder %s5145_s20, %s3970_s16  ;;  %p3975_p10 = scmp.lt.u32.totalorder %s5145_s20, %s5210_s6 }
 0x46f   : > { %p3976_p9 = scmp.lt.u32.totalorder %s3974_s2, %s3970_s16  ;;  %p3978_p1 = scmp.lt.u32.totalorder %s3970_s16, %s5145_s20 }
 0x470   : > { %p3972_p3 = pnand %p3971_p4, %p5255_p8 }
 0x471   : > { %p3977_p12 = por %p3976_p9, %p3975_p10 }
 0x472   : > { %p3973_p0 = pneg %p3972_p3 }
 0x473   : > { %p3979_p6 = por %p3978_p1, %p3977_p12 }
 0x475   : > { %p3980_p13 = pnand %p3979_p6, %p3973_p0 }
 0x477   : > { %3983 = shalt.err (!%p3980_p13)
}
 0x478   : > { %s4056_s9 = smov 128   ;;  %s4057_s23 = smov 8  }
 0x479   : > { %3592 = dma.vmem_to_hbm [thread:$0]  (%p5255_p8), %s5147_s12, 2048, %s5145_s20, %s2780_s27, %s4056_s9, %s4056_s9, %s4057_s23  }
 0x47a PF: > { %s5256_s21 = sld [smem:[#allocation15_spill]]  ;;  %s5257_s24 = sld [smem:[#allocation21_spill]] }
 0x47b   : > { %s5258_s26 = sld [smem:[#allocation18_spill]] }
 0x480   : > { %s2830_s17 = sand.u32 1, %s5256_s21   ;;  %p5259_p11 = scmp.ne.s32.totalorder %s5257_s24, 0 }
 0x481   : > { %p5260_p2 = scmp.ge.s32.totalorder %s5258_s26, 2  ;;  %s2831_s11 = scalar_lea.sflag [#allocation4], %s2830_s17 }
 0x483   : > { %p3607_p5 = pnand %p5260_p2, %p5259_p11 }
 0x485   : > { %4017 = dma.done.wait (!%p3607_p5), %s2831_s11, 2048  }
 0x486   : > { %4019 = vsyncadd (!%p3607_p5), %s2831_s11, 4294965248  ;;  %s2840_s1 = scalar_lea.sflag [#allocation10], %s2830_s17 }
 0x487   : > { %4021 = dma.done.wait (!%p3607_p5), %s2840_s1, 128  }
 0x488   : > { %4023 = vsyncadd (!%p3607_p5), %s2840_s1, 4294967168  ;;  %s30_s29 = sadd.s32 1, %s5258_s26   ;;  %s5261_s14 = sld [smem:[#allocation16_spill]] }
 0x489   : > { %p27_p7 = scmp.ge.s32.totalorder %s30_s29, 4   ;;  %s5262_s26 = sld [smem:[#allocation20_spill]] }
 0x48a   : > { %s5263_s27 = sld [smem:[#allocation17_spill]]  ;;  %s5264_s28 = sld [smem:[#allocation19_spill]] }
 0x48b   : > { %s5265_s24 = smov %s4030_s25  ;;  %29 = sbr.rel (!%p27_p7) target bundleno = 13 (0xd), region = 139 }
 0x48e   : > { %s5266_s25 = smov %s5261_s14 }
 0x492   :  { %2845 = vsyncpa [#allocation3], 1 }
 0x493   :  { %2847 = vsyncpa [#allocation3 + $0x1], 1 }
 0x494   :  { %2848 = vsyncpa [#allocation6], 1 }
 0x495   :  { %2850 = vsyncpa [#allocation6 + $0x1], 1 }
 0x496   :  { %2851 = vsyncpa [#allocation4], 1 }
 0x497   :  { %2853 = vsyncpa [#allocation4 + $0x1], 1 }
 0x498   :  { %2854 = vsyncpa [#allocation10], 1 }
 0x499   :  { %2856 = vsyncpa [#allocation10 + $0x1], 1 }

</bundles_post_ra>
